<compile_context>
chip_gen: v5e
topology: v5e:2x2
jax: 0.10.0
libtpu: 0.0.40
codegen_flags: <defaults>
</compile_context>

<pallas_src>
import functools
import math

import jax
import jax.numpy as jnp
from jax.experimental import pallas as pl
from jax.experimental.pallas import tpu as pltpu


# ----------------------------------------------------------------------------
# helpers
# ----------------------------------------------------------------------------
_INV_SQRT2 = 1.0 / math.sqrt(2.0)


def _vmem_limit_bytes():
    # Raise the scoped VMEM limit; stay well under physical capacity on every
    # chip (v7x has only 64 MiB per TC).
    try:
        cap = pltpu.get_tpu_info().vmem_capacity_bytes
    except Exception:
        cap = 64 * 1024 * 1024
    return int(cap) * 3 // 4


def _lane_target():
    # v6e / v7x have 256-wide MXUs -> fold to 256 lanes; v5e and older are
    # 128-wide, where fh=128 is the perfect fit (review: don't fold wider).
    try:
        kind = jax.devices()[0].device_kind.lower()
    except Exception:
        return 128
    if any(t in kind for t in ("v2", "v3", "v4", "v5")):
        return 128
    return 256


def _choose_fold(hidden_size):
    target = _lane_target()
    for lanes in (target, 128):
        if hidden_size <= lanes and lanes % hidden_size == 0:
            return lanes // hidden_size, lanes
    # TODO(synk): H values that don't divide 128 (e.g. 96) should be lane-padded
    # (zero-padded weights, masked stats) to avoid masked vst.msk stores; for
    # now fall back to unfolded rows.
    return 1, hidden_size


def _block_diag(w, k):
    if k == 1:
        return w
    fi, fo = w.shape
    out = jnp.zeros((k * fi, k * fo), w.dtype)
    for j in range(k):
        out = out.at[j * fi:(j + 1) * fi, j * fo:(j + 1) * fo].set(w)
    return out


def _gelu_exact(x):
    # Exact (erf-based) GELU via the Abramowitz & Stegun 7.1.26 erfc polynomial
    # (abs err ~1.5e-7 -> exact at the 1e-4 tolerance).  Branch-folded so there
    # is no sign() and no final erf multiply:
    #   q = erfc(|u|) = poly(t) * exp(-u^2),   t = 1/(1 + p|u|),  u = x/sqrt(2)
    #   1 + erf(u)   = 2 - q   (x >= 0)   |   q   (x < 0)
    a1, a2, a3, a4, a5 = 0.254829592, -0.284496736, 1.421413741, -1.453152027, 1.061405429
    p = 0.3275911
    u = x * _INV_SQRT2
    au = jnp.abs(u)
    # TODO(synk): flip approx=True (EUP vrcp) if the accuracy budget allows.
    t = pl.reciprocal(1.0 + p * au, approx=False)
    poly = ((((a5 * t + a4) * t + a3) * t + a2) * t + a1) * t
    q = poly * jnp.exp(-(au * au))
    one_plus_erf = jnp.where(x >= 0, 2.0 - q, q)
    return (0.5 * x) * one_plus_erf


def _content_gate(x, gate_params):
    # Tiny per-batch MLP: mean_S -> Linear(H,64) -> ReLU -> Linear(64,1) -> sigmoid.
    # O(B*64*H) FLOPs -> plain XLA (review: drop the extra pallas_call).
    # TODO(synk): on v5e this extra read of x (the seq-mean) could be fused into
    # a per-batch single-pass kernel if this op is hot at scale.
    gw1, gb1, gw2, gb2 = gate_params
    xm = jnp.mean(x, axis=1)                                  # (B, H)
    hid = jnp.maximum(xm @ gw1 + gb1, 0.0)                    # (B, 64)
    return jax.nn.sigmoid(hid @ gw2 + gb2)                    # (B, 1)


# ----------------------------------------------------------------------------
# main kernel
# ----------------------------------------------------------------------------
def _afm_kernel(fold, x_ref, g_ref, w1_ref, b1_ref, w2_ref, b2_ref,
                gamma_ref, beta_ref, *rest):
    """Per-row-tile kernel on lane-folded data.

    x_ref : (TB, fold*H)  -- 'fold' original rows packed along lanes
    g_ref : (TB, fold)    -- per-sub-row gate scalars
    Weights are block-diagonal (fold copies); biases/gamma/beta lane-tiled.
    All ops are row-local, so ragged-tail garbage rows never contaminate
    valid rows (their stores are masked by Pallas).
    """
    if fold > 1:
        e_ref, mred_ref, o_ref = rest
    else:
        (o_ref,) = rest

    x = x_ref[...]                                            # (TB, fold*H)

    # ---- Linear -> exact GELU -> Linear ----
    h = jnp.dot(x, w1_ref[...], preferred_element_type=jnp.float32) + b1_ref[...]
    h = _gelu_exact(h)                                        # (TB, fold*H/2)
    y = jnp.dot(h, w2_ref[...], preferred_element_type=jnp.float32) + b2_ref[...]

    # ---- LayerNorm (segmented per original row when lane-folded) ----
    # Kept as the numerically-safe mu -> d -> E[d^2] chain (the E[y^2]-mu^2
    # restructure has cancellation risk; see review notes).
    if fold > 1:
        mu = jnp.dot(y, mred_ref[...], preferred_element_type=jnp.float32)
        d = y - mu
        var = jnp.dot(d * d, mred_ref[...], preferred_element_type=jnp.float32)
    else:
        mu = jnp.mean(y, axis=-1, keepdims=True)
        d = y - mu
        var = jnp.mean(d * d, axis=-1, keepdims=True)
    y = d * jax.lax.rsqrt(var + 1e-5) * gamma_ref[...] + beta_ref[...]

    # ---- per-row gate, broadcast across each H-lane group ----
    if fold > 1:
        g = jnp.dot(g_ref[...], e_ref[...], preferred_element_type=jnp.float32)
    else:
        g = g_ref[...]                                        # (TB, 1) broadcasts

    # ---- ELU(x)+1 and blend:  o = elu1 + g*(y - elu1)  (2 fewer muls/elem) ----
    elu1 = jnp.where(x > 0, x + 1.0, jnp.exp(x))              # elu(x)+1, alpha=1
    o_ref[...] = elu1 + g * (y - elu1)


# ----------------------------------------------------------------------------
# builder: precompute folded parameters once, return forward(x, layer_idx)
# ----------------------------------------------------------------------------
def make_adaptive_feature_mapping(layer_params, gate_params):
    H = int(layer_params[0][0].shape[0])
    fold, fh = _choose_fold(H)

    # ---- parameter plumbing hoisted out of the forward (done ONCE) ----------
    folded_layers = []
    for (w1, b1, w2, b2, gamma, beta) in layer_params:
        folded_layers.append((
            _block_diag(w1, fold),                 # (fold*H,   fold*H/2)
            jnp.tile(b1, (1, fold)),               # (1, fold*H/2)
            _block_diag(w2, fold),                 # (fold*H/2, fold*H)
            jnp.tile(b2, (1, fold)),               # (1, fold*H)
            jnp.tile(gamma, (1, fold)),            # (1, fold*H)
            jnp.tile(beta, (1, fold)),             # (1, fold*H)
        ))
    if fold > 1:
        # gate-broadcast matrix: e[j, l] = 1 iff l // H == j
        e_mat = jnp.repeat(jnp.eye(fold, dtype=jnp.float32), H, axis=1)
        # segmented-mean matrix: mred[i, l] = 1/H iff i, l in the same H-group
        grp = jnp.arange(fh) // H
        mred = (grp[:, None] == grp[None, :]).astype(jnp.float32) / float(H)
        shared = (e_mat, mred)
    else:
        shared = ()

    vmem_limit = _vmem_limit_bytes()

    def forward(x, layer_idx):
        x = jnp.asarray(x, jnp.float32)
        B, S, H_in = x.shape
        if H_in != H:
            raise ValueError(f"expected hidden size {H}, got {H_in}")
        N = B * S

        # ---- content gate in plain XLA ----
        gate = _content_gate(x, gate_params)                          # (B, 1)
        gate_rows = jnp.broadcast_to(gate[:, None, :], (B, S, 1)).reshape(N, 1)

        # ---- lane folding (layout only; no copy when fold | N) ----
        rem = N % fold
        if rem == 0:
            nf = N // fold
            x_f = x.reshape(nf, fh)
            g_f = gate_rows.reshape(nf, fold)
        else:
            # TODO(synk): rare tail (< fold rows) still costs one pad copy and
            # one output slice; a fold=1 tail call would remove it.
            pad = fold - rem
            nf = (N + pad) // fold
            x_f = jnp.pad(x.reshape(N, H), ((0, pad), (0, 0))).reshape(nf, fh)
            g_f = jnp.pad(gate_rows, ((0, pad), (0, 0))).reshape(nf, fold)

        consts = folded_layers[layer_idx] + shared

        # ---- row-tile size budgeted against the real VMEM working set ------
        budget = int(vmem_limit * 0.8)
        weight_bytes = 4 * sum(int(a.size) for a in consts)  # single-buffered
        # per folded row: double-buffered x/out/gate blocks + ~6 fh-wide f32
        # in-kernel temporaries (h, y, d, elu1, gate-bcast, mu/var).
        per_row_bytes = 4 * (10 * fh + 2 * fold)
        cap = (budget - weight_bytes) // per_row_bytes
        cap = max(8, min(1024, cap)) // 8 * 8
        tbf = nf if nf <= cap else cap
        n_tiles = pl.cdiv(nf, tbf)

        x_spec = pl.BlockSpec((tbf, fh), lambda i: (i, 0))
        g_spec = pl.BlockSpec((tbf, fold), lambda i: (i, 0))
        o_spec = pl.BlockSpec((tbf, fh), lambda i: (i, 0))

        def run(single_buffer_consts):
            def const_spec(a):
                nd = a.ndim
                imap = lambda i, nd=nd: (0,) * nd
                if single_buffer_consts:
                    # Grid-invariant params: one VMEM buffer is enough (v7x VMEM).
                    return pl.BlockSpec(a.shape, imap,
                                        pipeline_mode=pl.Buffered(buffer_count=1))
                return pl.BlockSpec(a.shape, imap)

            return pl.pallas_call(
                functools.partial(_afm_kernel, fold),
                out_shape=jax.ShapeDtypeStruct((nf, fh), jnp.float32),
                grid_spec=pltpu.PrefetchScalarGridSpec(
                    num_scalar_prefetch=0,
                    grid=(n_tiles,),
                    in_specs=[x_spec, g_spec] + [const_spec(a) for a in consts],
                    out_specs=o_spec,
                ),
                compiler_params=pltpu.CompilerParams(
                    dimension_semantics=("parallel",),
                    vmem_limit_bytes=vmem_limit,
                ),
            )(x_f, g_f, *consts)

        try:
            out_f = run(True)
        except Exception:
            # Fallback for jax versions without per-spec buffer counts.
            out_f = run(False)

        if rem == 0:
            return out_f.reshape(B, S, H)
        return out_f.reshape(nf * fold, H)[:N].reshape(B, S, H)

    return forward


def adaptive_feature_mapping(x, layer_params, gate_params, layer_idx):
    """One-shot convenience wrapper (re-folds params every call)."""
    return make_adaptive_feature_mapping(layer_params, gate_params)(x, layer_idx)


# ----------------------------------------------------------------------------
# deterministic synthetic init mirroring the PyTorch module's shapes
# ----------------------------------------------------------------------------
def init_params(key, hidden_size, num_layers):
    half = hidden_size // 2
    keys = jax.random.split(key, 2 * num_layers + 4)

    def xavier(k, fan_in, fan_out, gain=0.1):
        bound = gain * math.sqrt(6.0 / (fan_in + fan_out))
        return jax.random.uniform(k, (fan_in, fan_out), jnp.float32, -bound, bound)

    layers = []
    ki = 0
    for _ in range(num_layers):
        w1 = xavier(keys[ki], hidden_size, half); ki += 1
        w2 = xavier(keys[ki], half, hidden_size); ki += 1
        b1 = jnp.zeros((1, half), jnp.float32)
        b2 = jnp.zeros((1, hidden_size), jnp.float32)
        gamma = jnp.ones((1, hidden_size), jnp.float32)   # LayerNorm weight
        beta = jnp.zeros((1, hidden_size), jnp.float32)   # LayerNorm bias
        layers.append((w1, b1, w2, b2, gamma, beta))

    def torch_linear(kw, kb, fan_in, fan_out):
        bound = 1.0 / math.sqrt(fan_in)
        w = jax.random.uniform(kw, (fan_in, fan_out), jnp.float32, -bound, bound)
        b = jax.random.uniform(kb, (1, fan_out), jnp.float32, -bound, bound)
        return w, b

    gw1, gb1 = torch_linear(keys[ki], keys[ki + 1], hidden_size, 64); ki += 2
    gw2, gb2 = torch_linear(keys[ki], keys[ki + 1], 64, 1); ki += 2
    return layers, (gw1, gb1, gw2, gb2)


def _reference(x, lp, gp):
    # Pure-JAX reference of the PyTorch forward (tolerance contract: 1e-4,
    # exact-GELU is realized with an erf polynomial inside the kernel).
    w1, b1, w2, b2, gamma, beta = lp
    gw1, gb1, gw2, gb2 = gp
    h = jax.nn.gelu(x @ w1 + b1[0], approximate=False)
    y = h @ w2 + b2[0]
    mu = y.mean(-1, keepdims=True)
    var = ((y - mu) ** 2).mean(-1, keepdims=True)
    y = (y - mu) / jnp.sqrt(var + 1e-5) * gamma[0] + beta[0]
    xm = x.mean(axis=1, keepdims=True)                        # (B, 1, H)
    g = jnp.maximum(xm @ gw1 + gb1[0], 0.0)                   # (B, 1, 64)
    gate = jax.nn.sigmoid(g @ gw2 + gb2[0])                   # (B, 1, 1)
    elu1 = jnp.where(x > 0, x + 1.0, jnp.exp(x))
    return gate * y + (1.0 - gate) * elu1


if __name__ == "__main__":
    hidden_size, num_layers = 32, 3
    B, S = 2, 8
    layer_idx = 1

    key = jax.random.PRNGKey(0)
    kx, kp = jax.random.split(key)
    x = jax.random.normal(kx, (B, S, hidden_size), jnp.float32)
    layer_params, gate_params = init_params(kp, hidden_size, num_layers)

    forward = make_adaptive_feature_mapping(layer_params, gate_params)
    out = forward(x, layer_idx)
    out = jax.block_until_ready(out)

    ref = _reference(x, layer_params[layer_idx], gate_params)
    err = float(jnp.max(jnp.abs(out - ref)))
    assert err < 1e-4, f"max abs error {err}"
    print("KERNEL_OK")
</pallas_src>

<mosaic_0001>
module attributes {stable_mosaic.version = 11 : i64} {
  func.func @_afm_kernel(%arg0: i32, %arg1: memref<2x256xf32, #tpu.memory_space<vmem>>, %arg2: memref<2x8xf32, #tpu.memory_space<vmem>>, %arg3: memref<256x128xf32, #tpu.memory_space<vmem>>, %arg4: memref<1x128xf32, #tpu.memory_space<vmem>>, %arg5: memref<128x256xf32, #tpu.memory_space<vmem>>, %arg6: memref<1x256xf32, #tpu.memory_space<vmem>>, %arg7: memref<1x256xf32, #tpu.memory_space<vmem>>, %arg8: memref<1x256xf32, #tpu.memory_space<vmem>>, %arg9: memref<8x256xf32, #tpu.memory_space<vmem>>, %arg10: memref<256x256xf32, #tpu.memory_space<vmem>>, %arg11: memref<2x256xf32, #tpu.memory_space<vmem>>) attributes {dimension_semantics = [#tpu.dimension_semantics<parallel>], iteration_bounds = array<i64: 1>, scalar_prefetch = 0 : i64, scratch_operands = 0 : i64, tpu.core_type = #tpu.core_type<tc>, window_params = [{transform_indices = @transform_0, window_bounds = array<i64: 2, 256>}, {transform_indices = @transform_1, window_bounds = array<i64: 2, 8>}, {pipeline_mode = #tpu.pipeline_mode<synchronous>, transform_indices = @transform_2, window_bounds = array<i64: 256, 128>}, {pipeline_mode = #tpu.pipeline_mode<synchronous>, transform_indices = @transform_3, window_bounds = array<i64: 1, 128>}, {pipeline_mode = #tpu.pipeline_mode<synchronous>, transform_indices = @transform_4, window_bounds = array<i64: 128, 256>}, {pipeline_mode = #tpu.pipeline_mode<synchronous>, transform_indices = @transform_5, window_bounds = array<i64: 1, 256>}, {pipeline_mode = #tpu.pipeline_mode<synchronous>, transform_indices = @transform_6, window_bounds = array<i64: 1, 256>}, {pipeline_mode = #tpu.pipeline_mode<synchronous>, transform_indices = @transform_7, window_bounds = array<i64: 1, 256>}, {pipeline_mode = #tpu.pipeline_mode<synchronous>, transform_indices = @transform_8, window_bounds = array<i64: 8, 256>}, {pipeline_mode = #tpu.pipeline_mode<synchronous>, transform_indices = @transform_9, window_bounds = array<i64: 256, 256>}, {transform_indices = @transform_10, window_bounds = array<i64: 2, 256>}]} {
    %c0 = arith.constant 0 : index
    %c0_0 = arith.constant 0 : index
    %0 = vector.load %arg1[%c0, %c0_0] : memref<2x256xf32, #tpu.memory_space<vmem>>, vector<2x256xf32>
    %c0_1 = arith.constant 0 : index
    %c0_2 = arith.constant 0 : index
    %1 = vector.load %arg3[%c0_1, %c0_2] : memref<256x128xf32, #tpu.memory_space<vmem>>, vector<256x128xf32>
    %cst = arith.constant dense<0.000000e+00> : vector<2x128xf32>
    %2 = tpu.matmul %0, %1, %cst {dimension_numbers = #tpu.dot_dimension_numbers<[1], [0], [0], [1], [0, 0, 1, 1], [], []>} : vector<2x256xf32>, vector<256x128xf32>, vector<2x128xf32> -> vector<2x128xf32>
    %c0_3 = arith.constant 0 : index
    %c0_4 = arith.constant 0 : index
    %3 = vector.load %arg4[%c0_3, %c0_4] : memref<1x128xf32, #tpu.memory_space<vmem>>, vector<1x128xf32>
    %4 = vector.broadcast %3 : vector<1x128xf32> to vector<2x128xf32>
    %5 = arith.addf %2, %4 : vector<2x128xf32>
    %cst_5 = arith.constant 0.707106769 : f32
    %6 = vector.broadcast %cst_5 : f32 to vector<2x128xf32>
    %7 = arith.mulf %5, %6 : vector<2x128xf32>
    %8 = math.absf %7 : vector<2x128xf32>
    %cst_6 = arith.constant 0.327591091 : f32
    %9 = vector.broadcast %cst_6 : f32 to vector<2x128xf32>
    %10 = arith.mulf %9, %8 : vector<2x128xf32>
    %cst_7 = arith.constant 1.000000e+00 : f32
    %11 = vector.broadcast %cst_7 : f32 to vector<2x128xf32>
    %12 = arith.addf %11, %10 : vector<2x128xf32>
    %13 = tpu.reciprocal %12 : vector<2x128xf32> -> vector<2x128xf32>
    %cst_8 = arith.constant 1.06140542 : f32
    %14 = vector.broadcast %cst_8 : f32 to vector<2x128xf32>
    %15 = arith.mulf %14, %13 : vector<2x128xf32>
    %cst_9 = arith.constant -1.45315206 : f32
    %16 = vector.broadcast %cst_9 : f32 to vector<2x128xf32>
    %17 = arith.addf %15, %16 : vector<2x128xf32>
    %18 = arith.mulf %17, %13 : vector<2x128xf32>
    %cst_10 = arith.constant 1.42141378 : f32
    %19 = vector.broadcast %cst_10 : f32 to vector<2x128xf32>
    %20 = arith.addf %18, %19 : vector<2x128xf32>
    %21 = arith.mulf %20, %13 : vector<2x128xf32>
    %cst_11 = arith.constant -0.284496725 : f32
    %22 = vector.broadcast %cst_11 : f32 to vector<2x128xf32>
    %23 = arith.addf %21, %22 : vector<2x128xf32>
    %24 = arith.mulf %23, %13 : vector<2x128xf32>
    %cst_12 = arith.constant 0.254829586 : f32
    %25 = vector.broadcast %cst_12 : f32 to vector<2x128xf32>
    %26 = arith.addf %24, %25 : vector<2x128xf32>
    %27 = arith.mulf %26, %13 : vector<2x128xf32>
    %28 = arith.mulf %8, %8 : vector<2x128xf32>
    %cst_13 = arith.constant 0.000000e+00 : f32
    %29 = vector.broadcast %cst_13 : f32 to vector<2x128xf32>
    %30 = arith.subf %29, %28 : vector<2x128xf32>
    %31 = math.exp %30 : vector<2x128xf32>
    %32 = arith.mulf %27, %31 : vector<2x128xf32>
    %cst_14 = arith.constant 0.000000e+00 : f32
    %33 = vector.broadcast %cst_14 : f32 to vector<2x128xf32>
    %34 = arith.cmpf oge, %5, %33 : vector<2x128xf32>
    %cst_15 = arith.constant 2.000000e+00 : f32
    %35 = vector.broadcast %cst_15 : f32 to vector<2x128xf32>
    %36 = arith.subf %35, %32 : vector<2x128xf32>
    %37 = arith.select %34, %36, %32 : vector<2x128xi1>, vector<2x128xf32>
    %cst_16 = arith.constant 5.000000e-01 : f32
    %38 = vector.broadcast %cst_16 : f32 to vector<2x128xf32>
    %39 = arith.mulf %38, %5 : vector<2x128xf32>
    %40 = arith.mulf %39, %37 : vector<2x128xf32>
    %c0_17 = arith.constant 0 : index
    %c0_18 = arith.constant 0 : index
    %41 = vector.load %arg5[%c0_17, %c0_18] : memref<128x256xf32, #tpu.memory_space<vmem>>, vector<128x256xf32>
    %cst_19 = arith.constant dense<0.000000e+00> : vector<2x256xf32>
    %42 = tpu.matmul %40, %41, %cst_19 {dimension_numbers = #tpu.dot_dimension_numbers<[1], [0], [0], [1], [0, 0, 1, 1], [], []>} : vector<2x128xf32>, vector<128x256xf32>, vector<2x256xf32> -> vector<2x256xf32>
    %c0_20 = arith.constant 0 : index
    %c0_21 = arith.constant 0 : index
    %43 = vector.load %arg6[%c0_20, %c0_21] : memref<1x256xf32, #tpu.memory_space<vmem>>, vector<1x256xf32>
    %44 = vector.broadcast %43 : vector<1x256xf32> to vector<2x256xf32>
    %45 = arith.addf %42, %44 : vector<2x256xf32>
    %c0_22 = arith.constant 0 : index
    %c0_23 = arith.constant 0 : index
    %46 = vector.load %arg10[%c0_22, %c0_23] : memref<256x256xf32, #tpu.memory_space<vmem>>, vector<256x256xf32>
    %cst_24 = arith.constant dense<0.000000e+00> : vector<2x256xf32>
    %47 = tpu.matmul %45, %46, %cst_24 {dimension_numbers = #tpu.dot_dimension_numbers<[1], [0], [0], [1], [0, 0, 1, 1], [], []>} : vector<2x256xf32>, vector<256x256xf32>, vector<2x256xf32> -> vector<2x256xf32>
    %48 = arith.subf %45, %47 : vector<2x256xf32>
    %49 = arith.mulf %48, %48 : vector<2x256xf32>
    %c0_25 = arith.constant 0 : index
    %c0_26 = arith.constant 0 : index
    %50 = vector.load %arg10[%c0_25, %c0_26] : memref<256x256xf32, #tpu.memory_space<vmem>>, vector<256x256xf32>
    %cst_27 = arith.constant dense<0.000000e+00> : vector<2x256xf32>
    %51 = tpu.matmul %49, %50, %cst_27 {dimension_numbers = #tpu.dot_dimension_numbers<[1], [0], [0], [1], [0, 0, 1, 1], [], []>} : vector<2x256xf32>, vector<256x256xf32>, vector<2x256xf32> -> vector<2x256xf32>
    %cst_28 = arith.constant 9.99999974E-6 : f32
    %52 = vector.broadcast %cst_28 : f32 to vector<2x256xf32>
    %53 = arith.addf %51, %52 : vector<2x256xf32>
    %54 = math.rsqrt %53 : vector<2x256xf32>
    %55 = arith.mulf %48, %54 : vector<2x256xf32>
    %c0_29 = arith.constant 0 : index
    %c0_30 = arith.constant 0 : index
    %56 = vector.load %arg7[%c0_29, %c0_30] : memref<1x256xf32, #tpu.memory_space<vmem>>, vector<1x256xf32>
    %57 = vector.broadcast %56 : vector<1x256xf32> to vector<2x256xf32>
    %58 = arith.mulf %55, %57 : vector<2x256xf32>
    %c0_31 = arith.constant 0 : index
    %c0_32 = arith.constant 0 : index
    %59 = vector.load %arg8[%c0_31, %c0_32] : memref<1x256xf32, #tpu.memory_space<vmem>>, vector<1x256xf32>
    %60 = vector.broadcast %59 : vector<1x256xf32> to vector<2x256xf32>
    %61 = arith.addf %58, %60 : vector<2x256xf32>
    %c0_33 = arith.constant 0 : index
    %c0_34 = arith.constant 0 : index
    %62 = vector.load %arg2[%c0_33, %c0_34] : memref<2x8xf32, #tpu.memory_space<vmem>>, vector<2x8xf32>
    %c0_35 = arith.constant 0 : index
    %c0_36 = arith.constant 0 : index
    %63 = vector.load %arg9[%c0_35, %c0_36] : memref<8x256xf32, #tpu.memory_space<vmem>>, vector<8x256xf32>
    %cst_37 = arith.constant dense<0.000000e+00> : vector<2x256xf32>
    %64 = tpu.matmul %62, %63, %cst_37 {dimension_numbers = #tpu.dot_dimension_numbers<[1], [0], [0], [1], [0, 0, 1, 1], [], []>} : vector<2x8xf32>, vector<8x256xf32>, vector<2x256xf32> -> vector<2x256xf32>
    %cst_38 = arith.constant 0.000000e+00 : f32
    %65 = vector.broadcast %cst_38 : f32 to vector<2x256xf32>
    %66 = arith.cmpf ogt, %0, %65 : vector<2x256xf32>
    %cst_39 = arith.constant 1.000000e+00 : f32
    %67 = vector.broadcast %cst_39 : f32 to vector<2x256xf32>
    %68 = arith.addf %0, %67 : vector<2x256xf32>
    %69 = math.exp %0 : vector<2x256xf32>
    %70 = arith.select %66, %68, %69 : vector<2x256xi1>, vector<2x256xf32>
    %71 = arith.subf %61, %70 : vector<2x256xf32>
    %72 = arith.mulf %64, %71 : vector<2x256xf32>
    %73 = arith.addf %70, %72 : vector<2x256xf32>
    %c0_40 = arith.constant 0 : index
    %c0_41 = arith.constant 0 : index
    %74 = vector.load %arg11[%c0_40, %c0_41] : memref<2x256xf32, #tpu.memory_space<vmem>>, vector<2x256xf32>
    tpu.vector_store %arg11[%c0_40, %c0_41], %73 {strides = array<i32>} : memref<2x256xf32, #tpu.memory_space<vmem>>, vector<2x256xf32>,
    return
  }
  func.func @transform_0(%arg0: i32) -> (i32, i32) {
    %c0_i32 = arith.constant 0 : i32
    %c0_i32_0 = arith.constant 0 : i32
    return %arg0, %c0_i32 : i32, i32
  }
  func.func @transform_1(%arg0: i32) -> (i32, i32) {
    %c0_i32 = arith.constant 0 : i32
    %c0_i32_0 = arith.constant 0 : i32
    return %arg0, %c0_i32 : i32, i32
  }
  func.func @transform_2(%arg0: i32) -> (i32, i32) {
    %c0_i32 = arith.constant 0 : i32
    %c0_i32_0 = arith.constant 0 : i32
    %c0_i32_1 = arith.constant 0 : i32
    return %c0_i32, %c0_i32_0 : i32, i32
  }
  func.func @transform_3(%arg0: i32) -> (i32, i32) {
    %c0_i32 = arith.constant 0 : i32
    %c0_i32_0 = arith.constant 0 : i32
    %c0_i32_1 = arith.constant 0 : i32
    return %c0_i32, %c0_i32_0 : i32, i32
  }
  func.func @transform_4(%arg0: i32) -> (i32, i32) {
    %c0_i32 = arith.constant 0 : i32
    %c0_i32_0 = arith.constant 0 : i32
    %c0_i32_1 = arith.constant 0 : i32
    return %c0_i32, %c0_i32_0 : i32, i32
  }
  func.func @transform_5(%arg0: i32) -> (i32, i32) {
    %c0_i32 = arith.constant 0 : i32
    %c0_i32_0 = arith.constant 0 : i32
    %c0_i32_1 = arith.constant 0 : i32
    return %c0_i32, %c0_i32_0 : i32, i32
  }
  func.func @transform_6(%arg0: i32) -> (i32, i32) {
    %c0_i32 = arith.constant 0 : i32
    %c0_i32_0 = arith.constant 0 : i32
    %c0_i32_1 = arith.constant 0 : i32
    return %c0_i32, %c0_i32_0 : i32, i32
  }
  func.func @transform_7(%arg0: i32) -> (i32, i32) {
    %c0_i32 = arith.constant 0 : i32
    %c0_i32_0 = arith.constant 0 : i32
    %c0_i32_1 = arith.constant 0 : i32
    return %c0_i32, %c0_i32_0 : i32, i32
  }
  func.func @transform_8(%arg0: i32) -> (i32, i32) {
    %c0_i32 = arith.constant 0 : i32
    %c0_i32_0 = arith.constant 0 : i32
    %c0_i32_1 = arith.constant 0 : i32
    return %c0_i32, %c0_i32_0 : i32, i32
  }
  func.func @transform_9(%arg0: i32) -> (i32, i32) {
    %c0_i32 = arith.constant 0 : i32
    %c0_i32_0 = arith.constant 0 : i32
    %c0_i32_1 = arith.constant 0 : i32
    return %c0_i32, %c0_i32_0 : i32, i32
  }
  func.func @transform_10(%arg0: i32) -> (i32, i32) {
    %c0_i32 = arith.constant 0 : i32
    %c0_i32_0 = arith.constant 0 : i32
    return %arg0, %c0_i32 : i32, i32
  }
}

module attributes {stable_mosaic.version = 11 : i64} {
  func.func @_afm_kernel(%arg0: i32, %arg1: memref<2x256xf32, #tpu.memory_space<vmem>>, %arg2: memref<2x8xf32, #tpu.memory_space<vmem>>, %arg3: memref<256x128xf32, #tpu.memory_space<vmem>>, %arg4: memref<1x128xf32, #tpu.memory_space<vmem>>, %arg5: memref<128x256xf32, #tpu.memory_space<vmem>>, %arg6: memref<1x256xf32, #tpu.memory_space<vmem>>, %arg7: memref<1x256xf32, #tpu.memory_space<vmem>>, %arg8: memref<1x256xf32, #tpu.memory_space<vmem>>, %arg9: memref<8x256xf32, #tpu.memory_space<vmem>>, %arg10: memref<256x256xf32, #tpu.memory_space<vmem>>, %arg11: memref<2x256xf32, #tpu.memory_space<vmem>>) attributes {dimension_semantics = [#tpu.dimension_semantics<parallel>], iteration_bounds = array<i64: 1>, scalar_prefetch = 0 : i64, scratch_operands = 0 : i64, tpu.core_type = #tpu.core_type<tc>, window_params = [{transform_indices = @transform_0, window_bounds = array<i64: 2, 256>}, {transform_indices = @transform_1, window_bounds = array<i64: 2, 8>}, {pipeline_mode = #tpu.pipeline_mode<synchronous>, transform_indices = @transform_2, window_bounds = array<i64: 256, 128>}, {pipeline_mode = #tpu.pipeline_mode<synchronous>, transform_indices = @transform_3, window_bounds = array<i64: 1, 128>}, {pipeline_mode = #tpu.pipeline_mode<synchronous>, transform_indices = @transform_4, window_bounds = array<i64: 128, 256>}, {pipeline_mode = #tpu.pipeline_mode<synchronous>, transform_indices = @transform_5, window_bounds = array<i64: 1, 256>}, {pipeline_mode = #tpu.pipeline_mode<synchronous>, transform_indices = @transform_6, window_bounds = array<i64: 1, 256>}, {pipeline_mode = #tpu.pipeline_mode<synchronous>, transform_indices = @transform_7, window_bounds = array<i64: 1, 256>}, {pipeline_mode = #tpu.pipeline_mode<synchronous>, transform_indices = @transform_8, window_bounds = array<i64: 8, 256>}, {pipeline_mode = #tpu.pipeline_mode<synchronous>, transform_indices = @transform_9, window_bounds = array<i64: 256, 256>}, {transform_indices = @transform_10, window_bounds = array<i64: 2, 256>}]} {
    %c0 = arith.constant 0 : index
    %c0_0 = arith.constant 0 : index
    %0 = vector.load %arg1[%c0, %c0_0] : memref<2x256xf32, #tpu.memory_space<vmem>>, vector<2x256xf32>
    %c0_1 = arith.constant 0 : index
    %c0_2 = arith.constant 0 : index
    %1 = vector.load %arg3[%c0_1, %c0_2] : memref<256x128xf32, #tpu.memory_space<vmem>>, vector<256x128xf32>
    %cst = arith.constant dense<0.000000e+00> : vector<2x128xf32>
    %2 = tpu.matmul %0, %1, %cst {dimension_numbers = #tpu.dot_dimension_numbers<[1], [0], [0], [1], [0, 0, 1, 1], [], []>} : vector<2x256xf32>, vector<256x128xf32>, vector<2x128xf32> -> vector<2x128xf32>
    %c0_3 = arith.constant 0 : index
    %c0_4 = arith.constant 0 : index
    %3 = vector.load %arg4[%c0_3, %c0_4] : memref<1x128xf32, #tpu.memory_space<vmem>>, vector<1x128xf32>
    %4 = vector.broadcast %3 : vector<1x128xf32> to vector<2x128xf32>
    %5 = arith.addf %2, %4 : vector<2x128xf32>
    %cst_5 = arith.constant 0.707106769 : f32
    %6 = vector.broadcast %cst_5 : f32 to vector<2x128xf32>
    %7 = arith.mulf %5, %6 : vector<2x128xf32>
    %8 = math.absf %7 : vector<2x128xf32>
    %cst_6 = arith.constant 0.327591091 : f32
    %9 = vector.broadcast %cst_6 : f32 to vector<2x128xf32>
    %10 = arith.mulf %9, %8 : vector<2x128xf32>
    %cst_7 = arith.constant 1.000000e+00 : f32
    %11 = vector.broadcast %cst_7 : f32 to vector<2x128xf32>
    %12 = arith.addf %11, %10 : vector<2x128xf32>
    %13 = tpu.reciprocal %12 : vector<2x128xf32> -> vector<2x128xf32>
    %cst_8 = arith.constant 1.06140542 : f32
    %14 = vector.broadcast %cst_8 : f32 to vector<2x128xf32>
    %15 = arith.mulf %14, %13 : vector<2x128xf32>
    %cst_9 = arith.constant -1.45315206 : f32
    %16 = vector.broadcast %cst_9 : f32 to vector<2x128xf32>
    %17 = arith.addf %15, %16 : vector<2x128xf32>
    %18 = arith.mulf %17, %13 : vector<2x128xf32>
    %cst_10 = arith.constant 1.42141378 : f32
    %19 = vector.broadcast %cst_10 : f32 to vector<2x128xf32>
    %20 = arith.addf %18, %19 : vector<2x128xf32>
    %21 = arith.mulf %20, %13 : vector<2x128xf32>
    %cst_11 = arith.constant -0.284496725 : f32
    %22 = vector.broadcast %cst_11 : f32 to vector<2x128xf32>
    %23 = arith.addf %21, %22 : vector<2x128xf32>
    %24 = arith.mulf %23, %13 : vector<2x128xf32>
    %cst_12 = arith.constant 0.254829586 : f32
    %25 = vector.broadcast %cst_12 : f32 to vector<2x128xf32>
    %26 = arith.addf %24, %25 : vector<2x128xf32>
    %27 = arith.mulf %26, %13 : vector<2x128xf32>
    %28 = arith.mulf %8, %8 : vector<2x128xf32>
    %cst_13 = arith.constant 0.000000e+00 : f32
    %29 = vector.broadcast %cst_13 : f32 to vector<2x128xf32>
    %30 = arith.subf %29, %28 : vector<2x128xf32>
    %31 = math.exp %30 : vector<2x128xf32>
    %32 = arith.mulf %27, %31 : vector<2x128xf32>
    %cst_14 = arith.constant 0.000000e+00 : f32
    %33 = vector.broadcast %cst_14 : f32 to vector<2x128xf32>
    %34 = arith.cmpf oge, %5, %33 : vector<2x128xf32>
    %cst_15 = arith.constant 2.000000e+00 : f32
    %35 = vector.broadcast %cst_15 : f32 to vector<2x128xf32>
    %36 = arith.subf %35, %32 : vector<2x128xf32>
    %37 = arith.select %34, %36, %32 : vector<2x128xi1>, vector<2x128xf32>
    %cst_16 = arith.constant 5.000000e-01 : f32
    %38 = vector.broadcast %cst_16 : f32 to vector<2x128xf32>
    %39 = arith.mulf %38, %5 : vector<2x128xf32>
    %40 = arith.mulf %39, %37 : vector<2x128xf32>
    %c0_17 = arith.constant 0 : index
    %c0_18 = arith.constant 0 : index
    %41 = vector.load %arg5[%c0_17, %c0_18] : memref<128x256xf32, #tpu.memory_space<vmem>>, vector<128x256xf32>
    %cst_19 = arith.constant dense<0.000000e+00> : vector<2x256xf32>
    %42 = tpu.matmul %40, %41, %cst_19 {dimension_numbers = #tpu.dot_dimension_numbers<[1], [0], [0], [1], [0, 0, 1, 1], [], []>} : vector<2x128xf32>, vector<128x256xf32>, vector<2x256xf32> -> vector<2x256xf32>
    %c0_20 = arith.constant 0 : index
    %c0_21 = arith.constant 0 : index
    %43 = vector.load %arg6[%c0_20, %c0_21] : memref<1x256xf32, #tpu.memory_space<vmem>>, vector<1x256xf32>
    %44 = vector.broadcast %43 : vector<1x256xf32> to vector<2x256xf32>
    %45 = arith.addf %42, %44 : vector<2x256xf32>
    %c0_22 = arith.constant 0 : index
    %c0_23 = arith.constant 0 : index
    %46 = vector.load %arg10[%c0_22, %c0_23] : memref<256x256xf32, #tpu.memory_space<vmem>>, vector<256x256xf32>
    %cst_24 = arith.constant dense<0.000000e+00> : vector<2x256xf32>
    %47 = tpu.matmul %45, %46, %cst_24 {dimension_numbers = #tpu.dot_dimension_numbers<[1], [0], [0], [1], [0, 0, 1, 1], [], []>} : vector<2x256xf32>, vector<256x256xf32>, vector<2x256xf32> -> vector<2x256xf32>
    %48 = arith.subf %45, %47 : vector<2x256xf32>
    %49 = arith.mulf %48, %48 : vector<2x256xf32>
    %c0_25 = arith.constant 0 : index
    %c0_26 = arith.constant 0 : index
    %50 = vector.load %arg10[%c0_25, %c0_26] : memref<256x256xf32, #tpu.memory_space<vmem>>, vector<256x256xf32>
    %cst_27 = arith.constant dense<0.000000e+00> : vector<2x256xf32>
    %51 = tpu.matmul %49, %50, %cst_27 {dimension_numbers = #tpu.dot_dimension_numbers<[1], [0], [0], [1], [0, 0, 1, 1], [], []>} : vector<2x256xf32>, vector<256x256xf32>, vector<2x256xf32> -> vector<2x256xf32>
    %cst_28 = arith.constant 9.99999974E-6 : f32
    %52 = vector.broadcast %cst_28 : f32 to vector<2x256xf32>
    %53 = arith.addf %51, %52 : vector<2x256xf32>
    %54 = math.rsqrt %53 : vector<2x256xf32>
    %55 = arith.mulf %48, %54 : vector<2x256xf32>
    %c0_29 = arith.constant 0 : index
    %c0_30 = arith.constant 0 : index
    %56 = vector.load %arg7[%c0_29, %c0_30] : memref<1x256xf32, #tpu.memory_space<vmem>>, vector<1x256xf32>
    %57 = vector.broadcast %56 : vector<1x256xf32> to vector<2x256xf32>
    %58 = arith.mulf %55, %57 : vector<2x256xf32>
    %c0_31 = arith.constant 0 : index
    %c0_32 = arith.constant 0 : index
    %59 = vector.load %arg8[%c0_31, %c0_32] : memref<1x256xf32, #tpu.memory_space<vmem>>, vector<1x256xf32>
    %60 = vector.broadcast %59 : vector<1x256xf32> to vector<2x256xf32>
    %61 = arith.addf %58, %60 : vector<2x256xf32>
    %c0_33 = arith.constant 0 : index
    %c0_34 = arith.constant 0 : index
    %62 = vector.load %arg2[%c0_33, %c0_34] : memref<2x8xf32, #tpu.memory_space<vmem>>, vector<2x8xf32>
    %c0_35 = arith.constant 0 : index
    %c0_36 = arith.constant 0 : index
    %63 = vector.load %arg9[%c0_35, %c0_36] : memref<8x256xf32, #tpu.memory_space<vmem>>, vector<8x256xf32>
    %cst_37 = arith.constant dense<0.000000e+00> : vector<2x256xf32>
    %64 = tpu.matmul %62, %63, %cst_37 {dimension_numbers = #tpu.dot_dimension_numbers<[1], [0], [0], [1], [0, 0, 1, 1], [], []>} : vector<2x8xf32>, vector<8x256xf32>, vector<2x256xf32> -> vector<2x256xf32>
    %cst_38 = arith.constant 0.000000e+00 : f32
    %65 = vector.broadcast %cst_38 : f32 to vector<2x256xf32>
    %66 = arith.cmpf ogt, %0, %65 : vector<2x256xf32>
    %cst_39 = arith.constant 1.000000e+00 : f32
    %67 = vector.broadcast %cst_39 : f32 to vector<2x256xf32>
    %68 = arith.addf %0, %67 : vector<2x256xf32>
    %69 = math.exp %0 : vector<2x256xf32>
    %70 = arith.select %66, %68, %69 : vector<2x256xi1>, vector<2x256xf32>
    %71 = arith.subf %61, %70 : vector<2x256xf32>
    %72 = arith.mulf %64, %71 : vector<2x256xf32>
    %73 = arith.addf %70, %72 : vector<2x256xf32>
    %c0_40 = arith.constant 0 : index
    %c0_41 = arith.constant 0 : index
    %74 = vector.load %arg11[%c0_40, %c0_41] : memref<2x256xf32, #tpu.memory_space<vmem>>, vector<2x256xf32>
    tpu.vector_store %arg11[%c0_40, %c0_41], %73 {strides = array<i32>} : memref<2x256xf32, #tpu.memory_space<vmem>>, vector<2x256xf32>,
    return
  }
  func.func @transform_0(%arg0: i32) -> (i32, i32) {
    %c0_i32 = arith.constant 0 : i32
    %c0_i32_0 = arith.constant 0 : i32
    return %arg0, %c0_i32 : i32, i32
  }
  func.func @transform_1(%arg0: i32) -> (i32, i32) {
    %c0_i32 = arith.constant 0 : i32
    %c0_i32_0 = arith.constant 0 : i32
    return %arg0, %c0_i32 : i32, i32
  }
  func.func @transform_2(%arg0: i32) -> (i32, i32) {
    %c0_i32 = arith.constant 0 : i32
    %c0_i32_0 = arith.constant 0 : i32
    %c0_i32_1 = arith.constant 0 : i32
    return %c0_i32, %c0_i32_0 : i32, i32
  }
  func.func @transform_3(%arg0: i32) -> (i32, i32) {
    %c0_i32 = arith.constant 0 : i32
    %c0_i32_0 = arith.constant 0 : i32
    %c0_i32_1 = arith.constant 0 : i32
    return %c0_i32, %c0_i32_0 : i32, i32
  }
  func.func @transform_4(%arg0: i32) -> (i32, i32) {
    %c0_i32 = arith.constant 0 : i32
    %c0_i32_0 = arith.constant 0 : i32
    %c0_i32_1 = arith.constant 0 : i32
    return %c0_i32, %c0_i32_0 : i32, i32
  }
  func.func @transform_5(%arg0: i32) -> (i32, i32) {
    %c0_i32 = arith.constant 0 : i32
    %c0_i32_0 = arith.constant 0 : i32
    %c0_i32_1 = arith.constant 0 : i32
    return %c0_i32, %c0_i32_0 : i32, i32
  }
  func.func @transform_6(%arg0: i32) -> (i32, i32) {
    %c0_i32 = arith.constant 0 : i32
    %c0_i32_0 = arith.constant 0 : i32
    %c0_i32_1 = arith.constant 0 : i32
    return %c0_i32, %c0_i32_0 : i32, i32
  }
  func.func @transform_7(%arg0: i32) -> (i32, i32) {
    %c0_i32 = arith.constant 0 : i32
    %c0_i32_0 = arith.constant 0 : i32
    %c0_i32_1 = arith.constant 0 : i32
    return %c0_i32, %c0_i32_0 : i32, i32
  }
  func.func @transform_8(%arg0: i32) -> (i32, i32) {
    %c0_i32 = arith.constant 0 : i32
    %c0_i32_0 = arith.constant 0 : i32
    %c0_i32_1 = arith.constant 0 : i32
    return %c0_i32, %c0_i32_0 : i32, i32
  }
  func.func @transform_9(%arg0: i32) -> (i32, i32) {
    %c0_i32 = arith.constant 0 : i32
    %c0_i32_0 = arith.constant 0 : i32
    %c0_i32_1 = arith.constant 0 : i32
    return %c0_i32, %c0_i32_0 : i32, i32
  }
  func.func @transform_10(%arg0: i32) -> (i32, i32) {
    %c0_i32 = arith.constant 0 : i32
    %c0_i32_0 = arith.constant 0 : i32
    return %arg0, %c0_i32 : i32, i32
  }
}

</mosaic_0001>

<bundles_post_ra>
// kernel: tpu_custom_call.1
= control target key start
LH: loop header
LB: loop body
LE: loop exit
PB: predicated region body
PF: predicated region fallthrough
CT: control target
= control target key end

     0   :  { %15 = vsyncpa [#allocation3], 0  ;;  %s1298_s0 = inlined_call_operand.hbm [shape: f32[2,256], index: 0, kind: input, shape index: {}]   ;;  %s1299_s1 = inlined_call_operand.hbm [shape: f32[2,8], index: 1, kind: input, shape index: {}]   ;;  %s1300_s2 = inlined_call_operand.hbm [shape: f32[256,128], index: 2, kind: input, shape index: {}]   ;;  %s1301_s3 = inlined_call_operand.hbm [shape: f32[1,128], index: 3, kind: input, shape index: {}]   ;;  %s1302_s4 = inlined_call_operand.hbm [shape: f32[128,256], index: 4, kind: input, shape index: {}]   ;;  %s1303_s5 = inlined_call_operand.vmem [shape: f32[1,256], index: 5, kind: input, shape index: {}]   ;;  %s1304_s6 = inlined_call_operand.vmem [shape: f32[1,256], index: 6, kind: input, shape index: {}]   ;;  %s1305_s7 = inlined_call_operand.vmem [shape: f32[1,256], index: 7, kind: input, shape index: {}]   ;;  %s1306_s8 = inlined_call_operand.hbm [shape: f32[8,256], index: 8, kind: input, shape index: {}]   ;;  %s1307_s9 = inlined_call_operand.hbm [shape: f32[256,256], index: 9, kind: input, shape index: {}]   ;;  %s1308_s10 = inlined_call_operand.hbm [shape: f32[2,256], index: 10, kind: output, shape index: {}]  }
   0x1   :  { %16 = vsyncpa [#allocation6], 0 }
   0x2   :  { %17 = vsyncpa [#allocation9], 0 }
   0x3   :  { %18 = vsyncpa [#allocation12], 0  ;;  %s36_s15 = sshll.u32 %s1299_s1, 4  ;;  %s37_s15 = int_to_ptr.hbm [resolvable:$true] %s36_s15 }
   0x4   :  { %19 = vsyncpa [#allocation4], 0  ;;  %s918_s16 = smov [#allocation5]   ;;  %s60_s20 = sshll.u32 %s1301_s3, 4  ;;  %s61_s20 = int_to_ptr.hbm [resolvable:$true] %s60_s20 }
   0x5   :  { %s38_s17 = sshll.u32 %s918_s16, 4  ;;  %s919_s21 = smov [#allocation8]   ;;  %s39_s17 = int_to_ptr.vmem [resolvable:$true] %s38_s17 }
   0x6   :  { %41 = dma.hbm_to_vmem [thread:$0]  %s37_s15, 32, %s39_s17, [#allocation6]  }
   0x7   :  { %s62_s22 = sshll.u32 %s919_s21, 4  ;;  %s90_s25 = sshll.u32 %s1306_s8, 4  ;;  %s63_s22 = int_to_ptr.vmem [resolvable:$true] %s62_s22  ;;  %s91_s25 = int_to_ptr.hbm [resolvable:$true] %s90_s25 }
   0x8   :  { %65 = dma.hbm_to_vmem [thread:$0]  %s61_s20, 16, %s63_s22, [#allocation9]  }
   0x9   :  { %s25_s27 = sshll.u32 %s1298_s0, 4  ;;  %s920_s28 = smov [#allocation11]   ;;  %s26_s27 = int_to_ptr.hbm [resolvable:$true] %s25_s27 }
   0xa   :  { %s92_s29 = sshll.u32 %s920_s28, 4  ;;  %s921_s3 = smov [#allocation2]   ;;  %s93_s29 = int_to_ptr.vmem [resolvable:$true] %s92_s29 }
   0xb   :  { %95 = dma.hbm_to_vmem [thread:$0]  %s91_s25, 256, %s93_s29, [#allocation12]  }
   0xc   :  { %s27_s30 = sshll.u32 %s921_s3, 4  ;;  %s46_s13 = sshll.u32 %s1300_s2, 4  ;;  %s28_s30 = int_to_ptr.vmem [resolvable:$true] %s27_s30  ;;  %s47_s13 = int_to_ptr.hbm [resolvable:$true] %s46_s13 }
   0xd   :  { %30 = dma.hbm_to_vmem [thread:$0]  %s26_s27, 64, %s28_s30, [#allocation3]  }
   0xe   :  { %s922_s8 = smov [#allocation7]   ;;  %s70_s0 = sshll.u32 %s1302_s4, 4  ;;  %s71_s0 = int_to_ptr.hbm [resolvable:$true] %s70_s0 }
   0xf   :  { %s48_s14 = sshll.u32 %s922_s8, 4  ;;  %s923_s17 = smov 128   ;;  %s49_s14 = int_to_ptr.vmem [resolvable:$true] %s48_s14 }
  0x10   :  { %s924_s18 = smov 8   ;;  %s925_s19 = smov [#allocation10]  }
  0x11   :  { %54 = dma.hbm_to_vmem [thread:$0]  %s47_s13, 4096, %s49_s14, [#allocation6], %s923_s17, %s923_s17, %s924_s18  }
  0x12   :  { %s72_s20 = sshll.u32 %s925_s19, 4  ;;  %s926_s21 = smov 256   ;;  %s73_s20 = int_to_ptr.vmem [resolvable:$true] %s72_s20 }
  0x13   :  { %s927_s22 = smov 16   ;;  %s100_s24 = sshll.u32 %s1307_s9, 4  ;;  %s101_s24 = int_to_ptr.hbm [resolvable:$true] %s100_s24 }
  0x14   :  { %78 = dma.hbm_to_vmem [thread:$0]  %s71_s0, 4096, %s73_s20, [#allocation9], %s926_s21, %s926_s21, %s927_s22  }
  0x15   :  { %s928_s25 = smov [#allocation13]  }
  0x16   :  { %s102_s1 = sshll.u32 %s928_s25, 4  ;;  %s103_s1 = int_to_ptr.vmem [resolvable:$true] %s102_s1 }
  0x17   :  { %108 = dma.hbm_to_vmem [thread:$0]  %s101_s24, 8192, %s103_s1, [#allocation12], %s926_s21, %s926_s21, %s927_s22  }
  0x18   :  { %908 = dma.done.wait [#allocation3], 64  }
  0x19   :  { %909 = vsyncadd [#allocation3], 4294967232 }
  0x1a   :  { %910 = dma.done.wait [#allocation6], 4128  }
  0x1b   :  { %911 = vsyncadd [#allocation6], 4294963168 }
  0x1c   :  { %912 = dma.done.wait [#allocation9], 4112  }
  0x1d   :  { %913 = vsyncadd [#allocation9], 4294963184 }
  0x1e   :  { %914 = dma.done.wait [#allocation12], 8448  }
  0x1f   :  { %915 = vsyncadd [#allocation12], 4294958848  ;;  %v153_v0 = vld [vmem:[#allocation7 + $0x78] sm:$0xff]  ;;  %v152_v1 = vld [vmem:[#allocation7 + $0x70] sm:$0xff]  ;;  %vm604_vm5 = vcmask 64512   ;;  %vm666_vm13 = vcmask 1041408  }
  0x20   :  { %v169_v2 = vld [vmem:[#allocation7 + $0xf8] sm:$0xff]  ;;  %180 = vmatpush.msra.mxu0 %v153_v0  ;;  %v168_v3 = vld [vmem:[#allocation7 + $0xf0] sm:$0xff]  ;;  %v151_v4 = vld [vmem:[#allocation7 + $0x68] sm:$0xff]  ;;  %s678_s30 = sshll.u32 %s1308_s10, 4  ;;  %s679_s30 = int_to_ptr.hbm [resolvable:$true] %s678_s30 }
  0x21   :  { %200 = vmatpush.msra.mxu1 %v169_v2  ;;  %v167_v5 = vld [vmem:[#allocation7 + $0xe8] sm:$0xff]  ;;  %v150_v6 = vld [vmem:[#allocation7 + $0x60] sm:$0xff]  ;;  %v149_v8 = vld [vmem:[#allocation7 + $0x58] sm:$0xff] }
  0x22   :  { %181 = vmatpush.msra.mxu0 %v152_v1  ;;  %v166_v7 = vld [vmem:[#allocation7 + $0xe0] sm:$0xff]  ;;  %v165_v9 = vld [vmem:[#allocation7 + $0xd8] sm:$0xff]  ;;  %v148_v10 = vld [vmem:[#allocation7 + $0x50] sm:$0xff] }
  0x23   :  { %201 = vmatpush.msra.mxu1 %v168_v3  ;;  %v164_v11 = vld [vmem:[#allocation7 + $0xd0] sm:$0xff]  ;;  %v147_v12 = vld [vmem:[#allocation7 + $0x48] sm:$0xff]  ;;  %v1006_v14 = vld [vmem:[#allocation2] sm:$0xf] }
  0x24   :  { %182 = vmatpush.msra.mxu0 %v151_v4  ;;  %v163_v13 = vld [vmem:[#allocation7 + $0xc8] sm:$0xff]  ;;  %1314 = vst [vmem:[#allocation20_spill] sm:$0xff] %v1006_v14  ;;  %v146_v15 = vld [vmem:[#allocation7 + $0x40] sm:$0xff]  ;;  %v145_v17 = vld [vmem:[#allocation7 + $0x38] sm:$0xff] }
  0x25   :  { %202 = vmatpush.msra.mxu1 %v167_v5  ;;  %175 = vst [vmem:[#allocation1] ss:$4 sm:$0xff] %v1006_v14  ;;  %v162_v16 = vld [vmem:[#allocation7 + $0xc0] sm:$0xff]  ;;  %v161_v18 = vld [vmem:[#allocation7 + $0xb8] sm:$0xff]  ;;  %v144_v19 = vld [vmem:[#allocation7 + $0x30] sm:$0xff] }
  0x26   :  { %183 = vmatpush.msra.mxu0 %v150_v6  ;;  %v160_v20 = vld [vmem:[#allocation7 + $0xb0] sm:$0xff]  ;;  %v143_v21 = vld [vmem:[#allocation7 + $0x28] sm:$0xff]  ;;  %v142_v23 = vld [vmem:[#allocation7 + $0x20] sm:$0xff] }
  0x27   :  { %203 = vmatpush.msra.mxu1 %v166_v7  ;;  %v159_v22 = vld [vmem:[#allocation7 + $0xa8] sm:$0xff]  ;;  %v158_v24 = vld [vmem:[#allocation7 + $0xa0] sm:$0xff]  ;;  %v141_v25 = vld [vmem:[#allocation7 + $0x18] sm:$0xff] }
  0x28   :  { %184 = vmatpush.msra.mxu0 %v149_v8  ;;  %v157_v26 = vld [vmem:[#allocation7 + $0x98] sm:$0xff]  ;;  %v140_v27 = vld [vmem:[#allocation7 + $0x10] sm:$0xff]  ;;  %v139_v29 = vld [vmem:[#allocation7 + $0x8] sm:$0xff] }
  0x29   :  { %204 = vmatpush.msra.mxu1 %v165_v9  ;;  %v156_v28 = vld [vmem:[#allocation7 + $0x90] sm:$0xff]  ;;  %v155_v30 = vld [vmem:[#allocation7 + $0x88] sm:$0xff]  ;;  %v138_v31 = vld [vmem:[#allocation7] sm:$0xff] }
  0x2a   :  { %185 = vmatpush.msra.mxu0 %v148_v10  ;;  %v154_v32 = vld [vmem:[#allocation7 + $0x80] sm:$0xff]  ;;  %v287_v35 = vld [vmem:[#allocation10 + $0xf0] sm:$0xff]  ;;  %v286_v38 = vld [vmem:[#allocation10 + $0xe8] sm:$0xff] }
  0x2b   :  { %205 = vmatpush.msra.mxu1 %v164_v11  ;;  %v288_v36 = vld [vmem:[#allocation10 + $0xf8] sm:$0xff]  ;;  %295 = vmatpush.msra.mxu2 %v287_v35  ;;  %v285_v37 = vld [vmem:[#allocation10 + $0xe0] sm:$0xff]  ;;  %v283_v39 = vld [vmem:[#allocation10 + $0xd0] sm:$0xff] }
  0x2c   :  { %186 = vmatpush.msra.mxu0 %v147_v12  ;;  %v176_v33 = vld.sshfl [vmem:[#allocation1] sm:$0xff pattern:$0x73625140]  ;;  %v177_v34 = vld.sshfl [vmem:[#allocation1 + $0x8] sm:$0xff pattern:$0x73625140]  ;;  %315 = vmatpush.msra.mxu3 %v288_v36 }
  0x2d   :  { %206 = vmatpush.msra.mxu1 %v163_v13  ;;  %v284_v40 = vld [vmem:[#allocation10 + $0xd8] sm:$0xff]  ;;  %296 = vmatpush.msra.mxu2 %v285_v37  ;;  %v281_v41 = vld [vmem:[#allocation10 + $0xc0] sm:$0xff]  ;;  %v282_v42 = vld [vmem:[#allocation10 + $0xc8] sm:$0xff] }
  0x2e   :  { %187 = vmatpush.msra.mxu0 %v146_v15  ;;  %316 = vmatpush.msra.mxu3 %v286_v38  ;;  %v705_v43 = vld [vmem:[#allocation8] ss:$0 sm:$0xff]  ;;  %v279_v44 = vld [vmem:[#allocation10 + $0xb0] sm:$0xff]  ;;  %v277_v46 = vld [vmem:[#allocation10 + $0xa0] sm:$0xff] }
  0x2f   :  { %207 = vmatpush.msra.mxu1 %v162_v16  ;;  %297 = vmatpush.msra.mxu2 %v283_v39  ;;  %v280_v45 = vld [vmem:[#allocation10 + $0xb8] sm:$0xff]  ;;  %v278_v47 = vld [vmem:[#allocation10 + $0xa8] sm:$0xff]  ;;  %v275_v51 = vld [vmem:[#allocation10 + $0x90] sm:$0xff] }
  0x30   :  { %188 = vmatpush.msra.mxu0 %v145_v17  ;;  %317 = vmatpush.msra.mxu3 %v284_v40  ;;  %v276_v52 = vld [vmem:[#allocation10 + $0x98] sm:$0xff]  ;;  %v273_v54 = vld [vmem:[#allocation10 + $0x80] sm:$0xff]  ;;  %v274_v55 = vld [vmem:[#allocation10 + $0x88] sm:$0xff] }
  0x31   :  { %208 = vmatpush.msra.mxu1 %v161_v18  ;;  %298 = vmatpush.msra.mxu2 %v281_v41  ;;  %v271_v57 = vld [vmem:[#allocation10 + $0x70] sm:$0xff]  ;;  %v272_v58 = vld [vmem:[#allocation10 + $0x78] sm:$0xff]  ;;  %v269_v60 = vld [vmem:[#allocation10 + $0x60] sm:$0xff] }
  0x32   :  { %189 = vmatpush.msra.mxu0 %v144_v19  ;;  %318 = vmatpush.msra.mxu3 %v282_v42  ;;  %v270_v61 = vld [vmem:[#allocation10 + $0x68] sm:$0xff]  ;;  %v267_v63 = vld [vmem:[#allocation10 + $0x50] sm:$0xff]  ;;  %v268_v0 = vld [vmem:[#allocation10 + $0x58] sm:$0xff] }
  0x33   :  { %209 = vmatpush.msra.mxu1 %v160_v20  ;;  %299 = vmatpush.msra.mxu2 %v279_v44  ;;  %v265_v2 = vld [vmem:[#allocation10 + $0x40] sm:$0xff]  ;;  %v266_v3 = vld [vmem:[#allocation10 + $0x48] sm:$0xff]  ;;  %v263_v4 = vld [vmem:[#allocation10 + $0x30] sm:$0xff] }
  0x34   :  { %190 = vmatpush.msra.mxu0 %v143_v21  ;;  %319 = vmatpush.msra.mxu3 %v280_v45  ;;  %v264_v5 = vld [vmem:[#allocation10 + $0x38] sm:$0xff]  ;;  %v261_v6 = vld [vmem:[#allocation10 + $0x20] sm:$0xff]  ;;  %v262_v7 = vld [vmem:[#allocation10 + $0x28] sm:$0xff] }
  0x35   :  { %210 = vmatpush.msra.mxu1 %v159_v22  ;;  %300 = vmatpush.msra.mxu2 %v277_v46  ;;  %v259_v8 = vld [vmem:[#allocation10 + $0x10] sm:$0xff]  ;;  %v260_v9 = vld [vmem:[#allocation10 + $0x18] sm:$0xff]  ;;  %v257_v11 = vld [vmem:[#allocation10] sm:$0xff] }
  0x36   :  { %191 = vmatpush.msra.mxu0 %v142_v23  ;;  %320 = vmatpush.msra.mxu3 %v278_v47  ;;  %v258_v12 = vld [vmem:[#allocation10 + $0x8] sm:$0xff]  ;;  %v1015_v17 = vld [vmem:[#allocation13 + $0xf0] sm:$0xff]  ;;  %v1025_v23 = vld [vmem:[#allocation13 + $0xe0] sm:$0xff] }
  0x37   :  { %211 = vmatpush.msra.mxu1 %v158_v24  ;;  %301 = vmatpush.msra.mxu2 %v275_v51  ;;  %v1017_v18 = vld [vmem:[#allocation13 + $0x1f0] sm:$0xff]  ;;  %v1019_v19 = vld [vmem:[#allocation13 + $0xf8] sm:$0xff]  ;;  %v1027_v24 = vld [vmem:[#allocation13 + $0x1e0] sm:$0xff] }
  0x38   :  { %192 = vmatpush.msra.mxu0 %v141_v25  ;;  %321 = vmatpush.msra.mxu3 %v276_v52  ;;  %v1023_v22 = vld [vmem:[#allocation13 + $0x1f8] sm:$0xff]  ;;  %v1031_v25 = vld [vmem:[#allocation13 + $0xe8] sm:$0xff]  ;;  %v1064_v40 = vld [vmem:[#allocation13 + $0xb0] sm:$0xff] }
  0x39   :  { %212 = vmatpush.msra.mxu1 %v157_v26  ;;  %302 = vmatpush.msra.mxu2 %v273_v54  ;;  %v1033_v26 = vld [vmem:[#allocation13 + $0x1e8] sm:$0xff]  ;;  %v1066_v41 = vld [vmem:[#allocation13 + $0x1b0] sm:$0xff]  ;;  %v1073_v44 = vld [vmem:[#allocation13 + $0x1b8] sm:$0xff] }
  0x3a   :  { %193 = vmatpush.msra.mxu0 %v140_v27  ;;  %322 = vmatpush.msra.mxu3 %v274_v55  ;;  %v1035_v27 = vld [vmem:[#allocation13 + $0xd0] sm:$0xff]  ;;  %v1054_v36 = vld [vmem:[#allocation13 + $0xc8] sm:$0xff]  ;;  %v1077_v45 = vld [vmem:[#allocation13 + $0xa0] sm:$0xff] }
  0x3b   :  { %213 = vmatpush.msra.mxu1 %v156_v28  ;;  %303 = vmatpush.msra.mxu2 %v271_v57  ;;  %v1056_v37 = vld [vmem:[#allocation13 + $0x1c8] sm:$0xff]  ;;  %v1079_v46 = vld [vmem:[#allocation13 + $0x1a0] sm:$0xff]  ;;  %v1089_v51 = vld [vmem:[#allocation13 + $0x90] sm:$0xff] }
  0x3c   :  { %194 = vmatpush.msra.mxu0 %v139_v29  ;;  %323 = vmatpush.msra.mxu3 %v272_v58  ;;  %v1039_v29 = vld [vmem:[#allocation13 + $0x1d0] sm:$0xff]  ;;  %v1096_v55 = vld [vmem:[#allocation13 + $0x98] sm:$0xff]  ;;  %v1102_v57 = vld [vmem:[#allocation13 + $0x80] sm:$0xff] }
  0x3d   :  { %214 = vmatpush.msra.mxu1 %v155_v30  ;;  %304 = vmatpush.msra.mxu2 %v269_v60  ;;  %v1041_v30 = vld [vmem:[#allocation13 + $0xd8] sm:$0xff]  ;;  %v1091_v52 = vld [vmem:[#allocation13 + $0x190] sm:$0xff]  ;;  %v1104_v58 = vld [vmem:[#allocation13 + $0x180] sm:$0xff] }
  0x3e   :  { %195 = vmatpush.msra.mxu0 %v138_v31  ;;  %324 = vmatpush.msra.mxu3 %v270_v61  ;;  %v1043_v31 = vld [vmem:[#allocation13 + $0x1d8] sm:$0xff]  ;;  %v1108_v60 = vld [vmem:[#allocation13 + $0x88] sm:$0xff]  ;;  %v1197_v14 = vld [vmem:[#allocation13 + $0x110] sm:$0xff] }
  0x3f   :  { %215 = vmatpush.msra.mxu1 %v154_v32  ;;  %196 = vmatmul.f32.vlgmr.msra.gmra.mxu0 %v176_v33  ;;  %v1048_v33 = vld [vmem:[#allocation13 + $0xc0] sm:$0xff]  ;;  %v1110_v61 = vld [vmem:[#allocation13 + $0x188] sm:$0xff] }
  0x40   :  { %216 = vmatmul.f32.vlgmr.msra.gmra.mxu1 %v177_v34  ;;  %305 = vmatpush.msra.mxu2 %v267_v63  ;;  %v1050_v34 = vld [vmem:[#allocation13 + $0x1c0] sm:$0xff]  ;;  %v1114_v63 = vld [vmem:[#allocation13 + $0x70] sm:$0xff] }
  0x41   :  { %325 = vmatpush.msra.mxu3 %v268_v0  ;;  %399 = vmatpush.msrb.mxu0 %v1015_v17  ;;  %v1116_v0 = vld [vmem:[#allocation13 + $0x170] sm:$0xff] }
  0x42   :  { %306 = vmatpush.msra.mxu2 %v265_v2  ;;  %419 = vmatpush.msrb.mxu1 %v1017_v18  ;;  %v1121_v2 = vld [vmem:[#allocation13 + $0x78] sm:$0xff] }
  0x43   :  { %326 = vmatpush.msra.mxu3 %v266_v3  ;;  %400 = vmatpush.msrb.mxu0 %v1025_v23  ;;  %v1123_v3 = vld [vmem:[#allocation13 + $0x178] sm:$0xff] }
  0x44   :  { %307 = vmatpush.msra.mxu2 %v263_v4  ;;  %420 = vmatpush.msrb.mxu1 %v1027_v24  ;;  %v1127_v4 = vld [vmem:[#allocation13 + $0x60] sm:$0xff] }
  0x45   :  { %327 = vmatpush.msra.mxu3 %v264_v5  ;;  %401 = vmatpush.msrb.mxu0 %v1035_v27  ;;  %v1129_v5 = vld [vmem:[#allocation13 + $0x160] sm:$0xff] }
  0x46   :  { %308 = vmatpush.msra.mxu2 %v261_v6  ;;  %421 = vmatpush.msrb.mxu1 %v1039_v29 }
  0x47   :  { %328 = vmatpush.msra.mxu3 %v262_v7  ;;  %402 = vmatpush.msrb.mxu0 %v1048_v33  ;;  %v1133_v7 = vld [vmem:[#allocation13 + $0x68] sm:$0xff] }
  0x48   :  { %309 = vmatpush.msra.mxu2 %v259_v8  ;;  %422 = vmatpush.msrb.mxu1 %v1050_v34  ;;  %v1135_v8 = vld [vmem:[#allocation13 + $0x168] sm:$0xff] }
  0x49   :  { %329 = vmatpush.msra.mxu3 %v260_v9  ;;  %403 = vmatpush.msrb.mxu0 %v1064_v40  ;;  %v1139_v9 = vld [vmem:[#allocation13 + $0x50] sm:$0xff] }
  0x4a   :  { %310 = vmatpush.msra.mxu2 %v257_v11  ;;  %423 = vmatpush.msrb.mxu1 %v1066_v41 }
  0x4b   :  { %330 = vmatpush.msra.mxu3 %v258_v12  ;;  %404 = vmatpush.msrb.mxu0 %v1077_v45  ;;  %v1146_v12 = vld [vmem:[#allocation13 + $0x58] sm:$0xff] }
  0x4c   :  { %439 = vmatpush.msrb.mxu2 %v1019_v19  ;;  %424 = vmatpush.msrb.mxu1 %v1079_v46 }
  0x4d   :  { %459 = vmatpush.msrb.mxu3 %v1023_v22  ;;  %405 = vmatpush.msrb.mxu0 %v1089_v51 }
  0x4e   :  { %440 = vmatpush.msrb.mxu2 %v1031_v25  ;;  %425 = vmatpush.msrb.mxu1 %v1091_v52 }
  0x4f   :  { %460 = vmatpush.msrb.mxu3 %v1033_v26  ;;  %406 = vmatpush.msrb.mxu0 %v1102_v57 }
  0x50   :  { %441 = vmatpush.msrb.mxu2 %v1041_v30  ;;  %426 = vmatpush.msrb.mxu1 %v1104_v58 }
  0x51   :  { %461 = vmatpush.msrb.mxu3 %v1043_v31  ;;  %407 = vmatpush.msrb.mxu0 %v1114_v63 }
  0x52   :  { %442 = vmatpush.msrb.mxu2 %v1054_v36  ;;  %427 = vmatpush.msrb.mxu1 %v1116_v0 }
  0x53   :  { %462 = vmatpush.msrb.mxu3 %v1056_v37  ;;  %408 = vmatpush.msrb.mxu0 %v1127_v4 }
  0x54   :  { %428 = vmatpush.msrb.mxu1 %v1129_v5 }
  0x55   :  { %463 = vmatpush.msrb.mxu3 %v1073_v44  ;;  %409 = vmatpush.msrb.mxu0 %v1139_v9 }
  0xbc   :  { %v197_v48 = vpop.f32.mrf.mxu0 }
  0xbd   :  { %v217_v49 = vpop.f32.mrf.mxu1  ;;  %v198_v50 = vadd.f32 %v705_v43, %v197_v48  ;;  %v1071_v43 = vld [vmem:[#allocation13 + $0xb8] sm:$0xff]  ;;  %v1083_v48 = vld [vmem:[#allocation13 + $0xa8] sm:$0xff] }
  0xbe   :  { %443 = vmatpush.msrb.mxu2 %v1071_v43 }
  0xbf   :  { %v1009_v53 = vadd.f32 %v217_v49, %v198_v50  ;;  %v1085_v49 = vld [vmem:[#allocation13 + $0x1a8] sm:$0xff] }
  0xc0   :  { %444 = vmatpush.msrb.mxu2 %v1083_v48  ;;  %464 = vmatpush.msrb.mxu3 %v1085_v49 }
  0xc1   :  { %v220_v56 = vmul.f32 0.70710677, %v1009_v53  ;;  %vm252_vm4 = vcmp.ge.f32.partialorder %v1009_v53, 0.0 }
  0xc2   :  { %445 = vmatpush.msrb.mxu2 %v1096_v55 }
  0xc3   :  { %v1012_v59 = vand.u32 2147483647, %v220_v56  ;;  %v1098_v56 = vld [vmem:[#allocation13 + $0x198] sm:$0xff] }
  0xc4   :  { %465 = vmatpush.msrb.mxu3 %v1098_v56  ;;  %446 = vmatpush.msrb.mxu2 %v1108_v60 }
  0xc5   :  { %v222_v62 = vmul.f32 0.3275911, %v1012_v59  ;;  %v247_v38 = vmul.f32 %v1012_v59, %v1012_v59 }
  0xc6   :  { %466 = vmatpush.msrb.mxu3 %v1110_v61  ;;  %447 = vmatpush.msrb.mxu2 %v1121_v2 }
  0xc7   :  { %v223_v1 = vadd.f32 1.0, %v222_v62  ;;  %v248_v50 = vsub.f32 0.0, %v247_v38 }
  0xc8   :  { %467 = vmatpush.msrb.mxu3 %v1123_v3  ;;  %448 = vmatpush.msrb.mxu2 %v1133_v7 }
  0xc9   :  { %706 = vrcp.f32 %v223_v1  ;;  %v235_v16 = vand.u32 2147483648, %v223_v1  ;;  %v233_v21 = vand.u32 2147483647, %v223_v1  ;;  %vm229_vm1 = vweird.f32 %v223_v1 }
  0xca   :  { %v249_v62 = vmul.f32 1.442695, %v248_v50  ;;  %468 = vmatpush.msrb.mxu3 %v1135_v8  ;;  %449 = vmatpush.msrb.mxu2 %v1146_v12 }
  0xcb   :  { %v236_v32 = vor.u32 1.1754944e-38, %v235_v16  ;;  %vm234_vm3 = vcmp.eq.f32.partialorder %v233_v21, 8.507059e+37  ;;  %v1154_v16 = vld [vmem:[#allocation13 + $0x140] sm:$0xff]  ;;  %v1158_v21 = vld [vmem:[#allocation13 + $0x48] sm:$0xff] }
  0xcc   :  { %708 = vpow2.f32 %v249_v62  ;;  %450 = vmatpush.msrb.mxu2 %v1158_v21 }
  0xcf   :  { %v707_v10 = vpop.eup %706 }
  0xd0   :  { %v225_v13 = vmul.f32 %v707_v10, %v223_v1  ;;  %vm230_vm0 = vweird.f32 %v707_v10 }
  0xd1   :  { %vm231_vm2 = vmor %vm229_vm1, %vm230_vm0 }
  0xd2   :  { %v226_v15 = vsub.f32 1.0, %v225_v13  ;;  %v1148_v13 = vld [vmem:[#allocation13 + $0x158] sm:$0xff]  ;;  %v709_v50 = vpop.eup %708 }
  0xd3   :  { %469 = vmatpush.msrb.mxu3 %v1148_v13 }
  0xd4   :  { %v227_v20 = vmul.f32 %v707_v10, %v226_v15  ;;  %v1152_v15 = vld [vmem:[#allocation13 + $0x40] sm:$0xff] }
  0xd5   :  { %410 = vmatpush.msrb.mxu0 %v1152_v15 }
  0xd6   :  { %v228_v28 = vadd.f32 %v707_v10, %v227_v20 }
  0xd8   :  { %v232_v35 = vsel %vm231_vm2, %v707_v10, %v228_v28  ;;  %v1141_v10 = vld [vmem:[#allocation13 + $0x150] sm:$0xff]  ;;  %v1160_v28 = vld [vmem:[#allocation13 + $0x148] sm:$0xff] }
  0xd9   :  { %v1060_v39 = vsel %vm234_vm3, %v236_v32, %v232_v35  ;;  %429 = vmatpush.msrb.mxu1 %v1141_v10  ;;  %v1164_v32 = vld [vmem:[#allocation13 + $0x30] sm:$0xff]  ;;  %470 = vmatpush.msrb.mxu3 %v1160_v28 }
  0xda   :  { %v238_v42 = vmul.f32 1.0614054, %v1060_v39  ;;  %v1166_v35 = vld [vmem:[#allocation13 + $0x130] sm:$0xff]  ;;  %411 = vmatpush.msrb.mxu0 %v1164_v32 }
  0xdb   :  { %430 = vmatpush.msrb.mxu1 %v1154_v16 }
  0xdc   :  { %v239_v47 = vadd.f32 -1.4531521, %v238_v42  ;;  %v1171_v42 = vld [vmem:[#allocation13 + $0x38] sm:$0xff] }
  0xdd   :  { %431 = vmatpush.msrb.mxu1 %v1166_v35  ;;  %451 = vmatpush.msrb.mxu2 %v1171_v42 }
  0xde   :  { %v240_v54 = vmul.f32 %v239_v47, %v1060_v39  ;;  %v1173_v47 = vld [vmem:[#allocation13 + $0x138] sm:$0xff] }
  0xdf   :  { %1315 = vst [vmem:[#allocation21_spill] sm:$0xff] %v1173_v47  ;;  %471 = vmatpush.msrb.mxu3 %v1173_v47  ;;  %v1199_v47 = vld [vmem:[#allocation13 + $0x18] sm:$0xff] }
  0xe0   :  { %v241_v59 = vadd.f32 1.4214138, %v240_v54  ;;  %v1177_v54 = vld [vmem:[#allocation13 + $0x20] sm:$0xff] }
  0xe1   :  { %412 = vmatpush.msrb.mxu0 %v1177_v54 }
  0xe2   :  { %v242_v1 = vmul.f32 %v241_v59, %v1060_v39  ;;  %v1179_v59 = vld [vmem:[#allocation13 + $0x120] sm:$0xff] }
  0xe3   :  { %1316 = vst [vmem:[#allocation22_spill] sm:$0xff] %v1179_v59  ;;  %432 = vmatpush.msrb.mxu1 %v1179_v59  ;;  %v1203_v59 = vld [vmem:[#allocation13 + $0x118] sm:$0xff] }
  0xe4   :  { %v243_v6 = vadd.f32 -0.28449672, %v242_v1  ;;  %v1185_v1 = vld [vmem:[#allocation13 + $0x128] sm:$0xff] }
  0xe5   :  { %472 = vmatpush.msrb.mxu3 %v1185_v1  ;;  %433 = vmatpush.msrb.mxu1 %v1197_v14 }
  0xe6   :  { %v244_v11 = vmul.f32 %v243_v6, %v1060_v39 }
  0xe7   :  { %473 = vmatpush.msrb.mxu3 %v1203_v59 }
  0xe8   :  { %v245_v20 = vadd.f32 0.2548296, %v244_v11  ;;  %v255_v11 = vmul.f32 0.5, %v1009_v53  ;;  %v1205_v53 = vld [vmem:[#allocation13] sm:$0xff] }
  0xea   :  { %v246_v38 = vmul.f32 %v245_v20, %v1060_v39  ;;  %v1183_v39 = vld [vmem:[#allocation13 + $0x28] sm:$0xff] }
  0xeb   :  { %1317 = vst [vmem:[#allocation23_spill] sm:$0xff] %v1183_v39  ;;  %452 = vmatpush.msrb.mxu2 %v1183_v39  ;;  %v1207_v39 = vld [vmem:[#allocation13 + $0x100] sm:$0xff] }
  0xec   :  { %v251_v62 = vmul.f32 %v709_v50, %v246_v38  ;;  %v1195_v50 = vld [vmem:[#allocation13 + $0x10] sm:$0xff]  ;;  %434 = vmatpush.msrb.mxu1 %v1207_v39 }
  0xed   :  { %413 = vmatpush.msrb.mxu0 %v1195_v50  ;;  %453 = vmatpush.msrb.mxu2 %v1199_v47 }
  0xee   :  { %v253_v6 = vsub.f32 2.0, %v251_v62  ;;  %503 = vmatpush.msra.mxu1 %v1017_v18 }
  0xef   :  { %414 = vmatpush.msrb.mxu0 %v1205_v53 }
  0xf0   :  { %v254_v20 = vsel %vm252_vm4, %v253_v6, %v251_v62  ;;  %v1211_v62 = vld [vmem:[#allocation13 + $0x8] sm:$0xff]  ;;  %504 = vmatpush.msra.mxu1 %v1027_v24 }
  0xf1   :  { %v256_v38 = vmul.f32 %v255_v11, %v254_v20  ;;  %v1213_v6 = vld [vmem:[#allocation13 + $0x108] sm:$0xff]  ;;  %454 = vmatpush.msrb.mxu2 %v1211_v62  ;;  %483 = vmatpush.msra.mxu0 %v1015_v17  ;;  %v289_v17 = vld [vmem:[%s1303_s5] sm:$0x3] }
  0xf2   :  { %474 = vmatpush.msrb.mxu3 %v1213_v6  ;;  %505 = vmatpush.msra.mxu1 %v1039_v29  ;;  %v291_v18 = vperm.slane %v289_v17, 0 }
  0xf3   :  { %311 = vmatmul.f32.vlgmr.msra.gmra.mxu2 %v256_v38  ;;  %331 = vmatmul.f32.vlgmr.msra.gmra.mxu3 %v256_v38 }
  0xf4   :  { %523 = vmatpush.msra.mxu2 %v1019_v19  ;;  %543 = vmatpush.msra.mxu3 %v1023_v22  ;;  %v292_v19 = vperm.slane %v289_v17, 1  ;;  %v1318_v22 = vld [vmem:[#allocation21_spill] sm:$0xff] }
  0xf5   :  { %484 = vmatpush.msra.mxu0 %v1025_v23  ;;  %506 = vmatpush.msra.mxu1 %v1050_v34  ;;  %v1319_v23 = vld [vmem:[#allocation23_spill] sm:$0xff] }
  0xf6   :  { %524 = vmatpush.msra.mxu2 %v1031_v25  ;;  %544 = vmatpush.msra.mxu3 %v1033_v26  ;;  %v1320_v26 = vld [vmem:[#allocation22_spill] sm:$0xff] }
  0xf7   :  { %485 = vmatpush.msra.mxu0 %v1035_v27  ;;  %507 = vmatpush.msra.mxu1 %v1066_v41 }
  0xf8   :  { %525 = vmatpush.msra.mxu2 %v1041_v30  ;;  %545 = vmatpush.msra.mxu3 %v1043_v31  ;;  %v603_v30 = vld [vmem:[#allocation11 + $0x8] sm:$0xff]  ;;  %v602_v31 = vld [vmem:[#allocation11] sm:$0xff] }
  0xf9   :  { %486 = vmatpush.msra.mxu0 %v1048_v33  ;;  %508 = vmatpush.msra.mxu1 %v1079_v46  ;;  %v601_v46 = vld [vmem:[#allocation5] sm:$0x3] }
  0xfa   :  { %526 = vmatpush.msra.mxu2 %v1054_v36  ;;  %546 = vmatpush.msra.mxu3 %v1056_v37 }
  0xfb   :  { %487 = vmatpush.msra.mxu0 %v1064_v40  ;;  %509 = vmatpush.msra.mxu1 %v1091_v52 }
  0xfc   :  { %527 = vmatpush.msra.mxu2 %v1071_v43  ;;  %547 = vmatpush.msra.mxu3 %v1073_v44 }
  0xfd   :  { %488 = vmatpush.msra.mxu0 %v1077_v45  ;;  %510 = vmatpush.msra.mxu1 %v1104_v58 }
  0xfe   :  { %528 = vmatpush.msra.mxu2 %v1083_v48  ;;  %548 = vmatpush.msra.mxu3 %v1085_v49  ;;  %v1321_v48 = vld [vmem:[#allocation20_spill] sm:$0xff] }
  0xff   :  { %489 = vmatpush.msra.mxu0 %v1089_v51  ;;  %511 = vmatpush.msra.mxu1 %v1116_v0  ;;  %v650_v49 = vmul.f32 1.442695, %v1321_v48  ;;  %v649_v51 = vadd.f32 1.0, %v1321_v48  ;;  %vm648_vm6 = vcmp.gt.f32.partialorder %v1321_v48, 0.0 }
 0x100   :  { %529 = vmatpush.msra.mxu2 %v1096_v55  ;;  %549 = vmatpush.msra.mxu3 %v1098_v56 }
 0x101   :  { %490 = vmatpush.msra.mxu0 %v1102_v57  ;;  %512 = vmatpush.msra.mxu1 %v1129_v5  ;;  %710 = vpow2.f32 %v650_v49 }
 0x102   :  { %530 = vmatpush.msra.mxu2 %v1108_v60  ;;  %550 = vmatpush.msra.mxu3 %v1110_v61 }
 0x103   :  { %491 = vmatpush.msra.mxu0 %v1114_v63  ;;  %513 = vmatpush.msra.mxu1 %v1141_v10 }
 0x104   :  { %531 = vmatpush.msra.mxu2 %v1121_v2  ;;  %551 = vmatpush.msra.mxu3 %v1123_v3 }
 0x105   :  { %492 = vmatpush.msra.mxu0 %v1127_v4  ;;  %514 = vmatpush.msra.mxu1 %v1154_v16 }
 0x106   :  { %532 = vmatpush.msra.mxu2 %v1133_v7  ;;  %552 = vmatpush.msra.mxu3 %v1135_v8 }
 0x107   :  { %493 = vmatpush.msra.mxu0 %v1139_v9  ;;  %515 = vmatpush.msra.mxu1 %v1166_v35  ;;  %v711_v52 = vpop.eup %710 }
 0x108   :  { %533 = vmatpush.msra.mxu2 %v1146_v12  ;;  %553 = vmatpush.msra.mxu3 %v1148_v13  ;;  %v652_v55 = vsel %vm648_vm6, %v649_v51, %v711_v52 }
 0x109   :  { %494 = vmatpush.msra.mxu0 %v1152_v15  ;;  %516 = vmatpush.msra.mxu1 %v1320_v26  ;;  %654 = vst [vmem:[#allocation1] ss:$4 sm:$0xff] %v652_v55  ;;  %v585_v15 = vld [vmem:[%s1304_s6] sm:$0x3]  ;;  %s929_s6 = smov [#allocation14]  }
 0x10a   :  { %534 = vmatpush.msra.mxu2 %v1158_v21  ;;  %554 = vmatpush.msra.mxu3 %v1160_v28 }
 0x10b   :  { %495 = vmatpush.msra.mxu0 %v1164_v32  ;;  %517 = vmatpush.msra.mxu1 %v1197_v14  ;;  %v587_v32 = vperm.slane %v585_v15, 0 }
 0x10c   :  { %535 = vmatpush.msra.mxu2 %v1171_v42  ;;  %555 = vmatpush.msra.mxu3 %v1318_v22  ;;  %v593_v42 = vld [vmem:[%s1305_s7] sm:$0x3]  ;;  %s676_s7 = sshll.u32 %s929_s6, 4  ;;  %s677_s7 = int_to_ptr.vmem [resolvable:$true] %s676_s7 }
 0x10d   :  { %496 = vmatpush.msra.mxu0 %v1177_v54  ;;  %518 = vmatpush.msra.mxu1 %v1207_v39  ;;  %v588_v39 = vperm.slane %v585_v15, 1  ;;  %v596_v20 = vperm.slane %v593_v42, 1 }
 0x10e   :  { %536 = vmatpush.msra.mxu2 %v1319_v23  ;;  %556 = vmatpush.msra.mxu3 %v1185_v1 }
 0x10f   :  { %497 = vmatpush.msra.mxu0 %v1195_v50 }
 0x110   :  { %537 = vmatpush.msra.mxu2 %v1199_v47  ;;  %557 = vmatpush.msra.mxu3 %v1203_v59  ;;  %v595_v59 = vperm.slane %v593_v42, 0 }
 0x111   :  { %498 = vmatpush.msra.mxu0 %v1205_v53  ;;  %v655_v53 = vld.sshfl [vmem:[#allocation1] sm:$0xff pattern:$0x73625140] }
 0x112   :  { %538 = vmatpush.msra.mxu2 %v1211_v62  ;;  %558 = vmatpush.msra.mxu3 %v1213_v6  ;;  %v656_v62 = vld.sshfl [vmem:[#allocation1 + $0x8] sm:$0xff pattern:$0x73625140] }
 0x176   :  { %v312_v24 = vpop.f32.mrf.mxu2  ;;  %v332_v25 = vpop.f32.mrf.mxu3 }
 0x177   :  { %v313_v27 = vadd.f32 %v312_v24, %v291_v18  ;;  %v333_v29 = vadd.f32 %v332_v25, %v292_v19 }
 0x179   :  { %415 = vmatmul.f32.vlgmr.msrb.gmra.mxu0 %v313_v27  ;;  %435 = vmatmul.f32.vlgmr.msrb.gmra.mxu1 %v333_v29 }
 0x17a   :  { %455 = vmatmul.f32.vlgmr.msrb.gmra.mxu2 %v313_v27  ;;  %475 = vmatmul.f32.vlgmr.msrb.gmra.mxu3 %v333_v29 }
 0x17b   :  { %643 = vmatpush.msrb.mxu1 %v603_v30  ;;  %623 = vmatpush.msrb.mxu0 %v602_v31 }
 0x1f6   :  { %v416_v33 = vpop.f32.mrf.mxu0  ;;  %v436_v14 = vpop.f32.mrf.mxu1 }
 0x1f7   :  { %v437_v34 = vadd.f32 %v436_v14, %v416_v33 }
 0x1f9   :  { %v479_v36 = vsub.f32 %v313_v27, %v437_v34 }
 0x1fb   :  { %v481_v37 = vmul.f32 %v479_v36, %v479_v36 }
 0x1fd   :  { %v456_v40 = vpop.f32.mrf.mxu2  ;;  %v476_v41 = vpop.f32.mrf.mxu3  ;;  %499 = vmatmul.f32.vlgmr.msra.gmra.mxu0 %v481_v37  ;;  %539 = vmatmul.f32.vlgmr.msra.gmra.mxu2 %v481_v37 }
 0x1fe   :  { %v477_v43 = vadd.f32 %v476_v41, %v456_v40 }
 0x200   :  { %v480_v44 = vsub.f32 %v333_v29, %v477_v43 }
 0x202   :  { %v482_v45 = vmul.f32 %v480_v44, %v480_v44 }
 0x204   :  { %519 = vmatmul.f32.vlgmr.msra.gmra.mxu1 %v482_v45  ;;  %559 = vmatmul.f32.vlgmr.msra.gmra.mxu3 %v482_v45 }
 0x205   :  { %691 = vmatmul.msk.f32.vlgmr.msrb.gmra.mxu0 %vm604_vm5, %v601_v46 }
 0x20c   :  { %692 = vmatmul.msk.f32.vlgmr.msrb.gmra.mxu1 %vm604_vm5, %v601_v46 }
 0x27a   :  { %v500_v56 = vpop.f32.mrf.mxu0 }
 0x27b   :  { %v501_v57 = vadd.f32 1e-05, %v500_v56 }
 0x280   :  { %v540_v61 = vpop.f32.mrf.mxu2 }
 0x281   :  { %v520_v58 = vpop.f32.mrf.mxu1  ;;  %v541_v63 = vadd.f32 1e-05, %v540_v61 }
 0x282   :  { %v521_v60 = vadd.f32 %v520_v58, %v501_v57  ;;  %v625_v22 = vpop.f32.mrf.mxu0 }
 0x284   :  { %712 = vrsqrt.f32 %v521_v60  ;;  %vm569_vm8 = vweird.f32 %v521_v60 }
 0x287   :  { %v560_v0 = vpop.f32.mrf.mxu3 }
 0x288   :  { %v561_v2 = vadd.f32 %v560_v0, %v541_v63 }
 0x289   :  { %v645_v17 = vpop.f32.mrf.mxu1 }
 0x28a   :  { %v713_v3 = vpop.eup %712  ;;  %714 = vrsqrt.f32 %v561_v2  ;;  %vm579_vm11 = vweird.f32 %v561_v2 }
 0x28b   :  { %v564_v4 = vmul.f32 %v713_v3, %v521_v60  ;;  %vm570_vm7 = vweird.f32 %v713_v3 }
 0x28c   :  { %vm571_vm9 = vmor %vm569_vm8, %vm570_vm7 }
 0x28d   :  { %v565_v5 = vmul.f32 %v713_v3, %v564_v4 }
 0x28f   :  { %v566_v7 = vmul.f32 0.5, %v565_v5 }
 0x290   :  { %v715_v8 = vpop.eup %714 }
 0x291   :  { %v567_v9 = vsub.f32 1.5, %v566_v7  ;;  %v574_v10 = vmul.f32 %v715_v8, %v561_v2  ;;  %vm580_vm10 = vweird.f32 %v715_v8 }
 0x292   :  { %vm581_vm12 = vmor %vm579_vm11, %vm580_vm10 }
 0x293   :  { %v568_v12 = vmul.f32 %v713_v3, %v567_v9  ;;  %v575_v13 = vmul.f32 %v715_v8, %v574_v10 }
 0x295   :  { %v572_v16 = vsel %vm571_vm9, %v713_v3, %v568_v12  ;;  %v576_v21 = vmul.f32 0.5, %v575_v13 }
 0x296   :  { %v583_v28 = vmul.f32 %v572_v16, %v479_v36 }
 0x297   :  { %v577_v35 = vsub.f32 1.5, %v576_v21 }
 0x298   :  { %v591_v54 = vmul.f32 %v587_v32, %v583_v28 }
 0x299   :  { %v578_v47 = vmul.f32 %v715_v8, %v577_v35 }
 0x29a   :  { %v599_v38 = vadd.f32 %v595_v59, %v591_v54 }
 0x29b   :  { %v582_v1 = vsel %vm581_vm12, %v715_v8, %v578_v47 }
 0x29c   :  { %v584_v11 = vmul.f32 %v582_v1, %v480_v44  ;;  %v659_v18 = vsub.f32 %v599_v38, %v655_v53 }
 0x29e   :  { %v592_v50 = vmul.f32 %v588_v39, %v584_v11  ;;  %v661_v24 = vmul.f32 %v659_v18, %v625_v22 }
 0x2a0   :  { %v600_v6 = vadd.f32 %v596_v20, %v592_v50 }
 0x2a2   :  { %v660_v19 = vsub.f32 %v600_v6, %v656_v62 }
 0x2a4   :  { %v662_v23 = vmul.f32 %v660_v19, %v645_v17 }
 0x2a6   :  { %v665_v25 = vrot.slane %v662_v23, 6 }
 0x2a8   :  { %v667_v26 = vsel %vm666_vm13, %v661_v24, %v665_v25 }
 0x2a9   :  { %v669_v27 = vadd.f32 %v667_v26, %v652_v55 }
 0x2ab   :  { %670 = vst [vmem:[#allocation14] sm:$0xf] %v669_v27 }
 0x2ac   :  { %681 = dma.vmem_to_hbm [thread:$0]  %s677_s7, 64, %s679_s30, [#allocation4]  }
 0x2ad   :  { %916 = dma.done.wait [#allocation4], 64  }
 0x2ae   :  { %917 = vsyncadd [#allocation4], 4294967232 }
 0x2af   :  { %686 = vsyncpa [#allocation3], 1 }
 0x2b0   :  { %687 = vsyncpa [#allocation6], 1 }
 0x2b1   :  { %688 = vsyncpa [#allocation9], 1 }
 0x2b2   :  { %689 = vsyncpa [#allocation12], 1 }
 0x2b3   :  { %690 = vsyncpa [#allocation4], 1 }

// kernel: tpu_custom_call.1
= control target key start
LH: loop header
LB: loop body
LE: loop exit
PB: predicated region body
PF: predicated region fallthrough
CT: control target
= control target key end

     0   :  { %15 = vsyncpa [#allocation3], 0  ;;  %s1298_s0 = inlined_call_operand.hbm [shape: f32[2,256], index: 0, kind: input, shape index: {}]   ;;  %s1299_s1 = inlined_call_operand.hbm [shape: f32[2,8], index: 1, kind: input, shape index: {}]   ;;  %s1300_s2 = inlined_call_operand.hbm [shape: f32[256,128], index: 2, kind: input, shape index: {}]   ;;  %s1301_s3 = inlined_call_operand.hbm [shape: f32[1,128], index: 3, kind: input, shape index: {}]   ;;  %s1302_s4 = inlined_call_operand.hbm [shape: f32[128,256], index: 4, kind: input, shape index: {}]   ;;  %s1303_s5 = inlined_call_operand.vmem [shape: f32[1,256], index: 5, kind: input, shape index: {}]   ;;  %s1304_s6 = inlined_call_operand.vmem [shape: f32[1,256], index: 6, kind: input, shape index: {}]   ;;  %s1305_s7 = inlined_call_operand.vmem [shape: f32[1,256], index: 7, kind: input, shape index: {}]   ;;  %s1306_s8 = inlined_call_operand.hbm [shape: f32[8,256], index: 8, kind: input, shape index: {}]   ;;  %s1307_s9 = inlined_call_operand.hbm [shape: f32[256,256], index: 9, kind: input, shape index: {}]   ;;  %s1308_s10 = inlined_call_operand.hbm [shape: f32[2,256], index: 10, kind: output, shape index: {}]  }
   0x1   :  { %16 = vsyncpa [#allocation6], 0 }
   0x2   :  { %17 = vsyncpa [#allocation9], 0 }
   0x3   :  { %18 = vsyncpa [#allocation12], 0  ;;  %s36_s15 = sshll.u32 %s1299_s1, 4  ;;  %s37_s15 = int_to_ptr.hbm [resolvable:$true] %s36_s15 }
   0x4   :  { %19 = vsyncpa [#allocation4], 0  ;;  %s918_s16 = smov [#allocation5]   ;;  %s60_s20 = sshll.u32 %s1301_s3, 4  ;;  %s61_s20 = int_to_ptr.hbm [resolvable:$true] %s60_s20 }
   0x5   :  { %s38_s17 = sshll.u32 %s918_s16, 4  ;;  %s919_s21 = smov [#allocation8]   ;;  %s39_s17 = int_to_ptr.vmem [resolvable:$true] %s38_s17 }
   0x6   :  { %41 = dma.hbm_to_vmem [thread:$0]  %s37_s15, 32, %s39_s17, [#allocation6]  }
   0x7   :  { %s62_s22 = sshll.u32 %s919_s21, 4  ;;  %s90_s25 = sshll.u32 %s1306_s8, 4  ;;  %s63_s22 = int_to_ptr.vmem [resolvable:$true] %s62_s22  ;;  %s91_s25 = int_to_ptr.hbm [resolvable:$true] %s90_s25 }
   0x8   :  { %65 = dma.hbm_to_vmem [thread:$0]  %s61_s20, 16, %s63_s22, [#allocation9]  }
   0x9   :  { %s25_s27 = sshll.u32 %s1298_s0, 4  ;;  %s920_s28 = smov [#allocation11]   ;;  %s26_s27 = int_to_ptr.hbm [resolvable:$true] %s25_s27 }
   0xa   :  { %s92_s29 = sshll.u32 %s920_s28, 4  ;;  %s921_s3 = smov [#allocation2]   ;;  %s93_s29 = int_to_ptr.vmem [resolvable:$true] %s92_s29 }
   0xb   :  { %95 = dma.hbm_to_vmem [thread:$0]  %s91_s25, 256, %s93_s29, [#allocation12]  }
   0xc   :  { %s27_s30 = sshll.u32 %s921_s3, 4  ;;  %s46_s13 = sshll.u32 %s1300_s2, 4  ;;  %s28_s30 = int_to_ptr.vmem [resolvable:$true] %s27_s30  ;;  %s47_s13 = int_to_ptr.hbm [resolvable:$true] %s46_s13 }
   0xd   :  { %30 = dma.hbm_to_vmem [thread:$0]  %s26_s27, 64, %s28_s30, [#allocation3]  }
   0xe   :  { %s922_s8 = smov [#allocation7]   ;;  %s70_s0 = sshll.u32 %s1302_s4, 4  ;;  %s71_s0 = int_to_ptr.hbm [resolvable:$true] %s70_s0 }
   0xf   :  { %s48_s14 = sshll.u32 %s922_s8, 4  ;;  %s923_s17 = smov 128   ;;  %s49_s14 = int_to_ptr.vmem [resolvable:$true] %s48_s14 }
  0x10   :  { %s924_s18 = smov 8   ;;  %s925_s19 = smov [#allocation10]  }
  0x11   :  { %54 = dma.hbm_to_vmem [thread:$0]  %s47_s13, 4096, %s49_s14, [#allocation6], %s923_s17, %s923_s17, %s924_s18  }
  0x12   :  { %s72_s20 = sshll.u32 %s925_s19, 4  ;;  %s926_s21 = smov 256   ;;  %s73_s20 = int_to_ptr.vmem [resolvable:$true] %s72_s20 }
  0x13   :  { %s927_s22 = smov 16   ;;  %s100_s24 = sshll.u32 %s1307_s9, 4  ;;  %s101_s24 = int_to_ptr.hbm [resolvable:$true] %s100_s24 }
  0x14   :  { %78 = dma.hbm_to_vmem [thread:$0]  %s71_s0, 4096, %s73_s20, [#allocation9], %s926_s21, %s926_s21, %s927_s22  }
  0x15   :  { %s928_s25 = smov [#allocation13]  }
  0x16   :  { %s102_s1 = sshll.u32 %s928_s25, 4  ;;  %s103_s1 = int_to_ptr.vmem [resolvable:$true] %s102_s1 }
  0x17   :  { %108 = dma.hbm_to_vmem [thread:$0]  %s101_s24, 8192, %s103_s1, [#allocation12], %s926_s21, %s926_s21, %s927_s22  }
  0x18   :  { %908 = dma.done.wait [#allocation3], 64  }
  0x19   :  { %909 = vsyncadd [#allocation3], 4294967232 }
  0x1a   :  { %910 = dma.done.wait [#allocation6], 4128  }
  0x1b   :  { %911 = vsyncadd [#allocation6], 4294963168 }
  0x1c   :  { %912 = dma.done.wait [#allocation9], 4112  }
  0x1d   :  { %913 = vsyncadd [#allocation9], 4294963184 }
  0x1e   :  { %914 = dma.done.wait [#allocation12], 8448  }
  0x1f   :  { %915 = vsyncadd [#allocation12], 4294958848  ;;  %v153_v0 = vld [vmem:[#allocation7 + $0x78] sm:$0xff]  ;;  %v152_v1 = vld [vmem:[#allocation7 + $0x70] sm:$0xff]  ;;  %vm604_vm5 = vcmask 64512   ;;  %vm666_vm13 = vcmask 1041408  }
  0x20   :  { %v169_v2 = vld [vmem:[#allocation7 + $0xf8] sm:$0xff]  ;;  %180 = vmatpush.msra.mxu0 %v153_v0  ;;  %v168_v3 = vld [vmem:[#allocation7 + $0xf0] sm:$0xff]  ;;  %v151_v4 = vld [vmem:[#allocation7 + $0x68] sm:$0xff]  ;;  %s678_s30 = sshll.u32 %s1308_s10, 4  ;;  %s679_s30 = int_to_ptr.hbm [resolvable:$true] %s678_s30 }
  0x21   :  { %200 = vmatpush.msra.mxu1 %v169_v2  ;;  %v167_v5 = vld [vmem:[#allocation7 + $0xe8] sm:$0xff]  ;;  %v150_v6 = vld [vmem:[#allocation7 + $0x60] sm:$0xff]  ;;  %v149_v8 = vld [vmem:[#allocation7 + $0x58] sm:$0xff] }
  0x22   :  { %181 = vmatpush.msra.mxu0 %v152_v1  ;;  %v166_v7 = vld [vmem:[#allocation7 + $0xe0] sm:$0xff]  ;;  %v165_v9 = vld [vmem:[#allocation7 + $0xd8] sm:$0xff]  ;;  %v148_v10 = vld [vmem:[#allocation7 + $0x50] sm:$0xff] }
  0x23   :  { %201 = vmatpush.msra.mxu1 %v168_v3  ;;  %v164_v11 = vld [vmem:[#allocation7 + $0xd0] sm:$0xff]  ;;  %v147_v12 = vld [vmem:[#allocation7 + $0x48] sm:$0xff]  ;;  %v1006_v14 = vld [vmem:[#allocation2] sm:$0xf] }
  0x24   :  { %182 = vmatpush.msra.mxu0 %v151_v4  ;;  %v163_v13 = vld [vmem:[#allocation7 + $0xc8] sm:$0xff]  ;;  %1314 = vst [vmem:[#allocation20_spill] sm:$0xff] %v1006_v14  ;;  %v146_v15 = vld [vmem:[#allocation7 + $0x40] sm:$0xff]  ;;  %v145_v17 = vld [vmem:[#allocation7 + $0x38] sm:$0xff] }
  0x25   :  { %202 = vmatpush.msra.mxu1 %v167_v5  ;;  %175 = vst [vmem:[#allocation1] ss:$4 sm:$0xff] %v1006_v14  ;;  %v162_v16 = vld [vmem:[#allocation7 + $0xc0] sm:$0xff]  ;;  %v161_v18 = vld [vmem:[#allocation7 + $0xb8] sm:$0xff]  ;;  %v144_v19 = vld [vmem:[#allocation7 + $0x30] sm:$0xff] }
  0x26   :  { %183 = vmatpush.msra.mxu0 %v150_v6  ;;  %v160_v20 = vld [vmem:[#allocation7 + $0xb0] sm:$0xff]  ;;  %v143_v21 = vld [vmem:[#allocation7 + $0x28] sm:$0xff]  ;;  %v142_v23 = vld [vmem:[#allocation7 + $0x20] sm:$0xff] }
  0x27   :  { %203 = vmatpush.msra.mxu1 %v166_v7  ;;  %v159_v22 = vld [vmem:[#allocation7 + $0xa8] sm:$0xff]  ;;  %v158_v24 = vld [vmem:[#allocation7 + $0xa0] sm:$0xff]  ;;  %v141_v25 = vld [vmem:[#allocation7 + $0x18] sm:$0xff] }
  0x28   :  { %184 = vmatpush.msra.mxu0 %v149_v8  ;;  %v157_v26 = vld [vmem:[#allocation7 + $0x98] sm:$0xff]  ;;  %v140_v27 = vld [vmem:[#allocation7 + $0x10] sm:$0xff]  ;;  %v139_v29 = vld [vmem:[#allocation7 + $0x8] sm:$0xff] }
  0x29   :  { %204 = vmatpush.msra.mxu1 %v165_v9  ;;  %v156_v28 = vld [vmem:[#allocation7 + $0x90] sm:$0xff]  ;;  %v155_v30 = vld [vmem:[#allocation7 + $0x88] sm:$0xff]  ;;  %v138_v31 = vld [vmem:[#allocation7] sm:$0xff] }
  0x2a   :  { %185 = vmatpush.msra.mxu0 %v148_v10  ;;  %v154_v32 = vld [vmem:[#allocation7 + $0x80] sm:$0xff]  ;;  %v287_v35 = vld [vmem:[#allocation10 + $0xf0] sm:$0xff]  ;;  %v286_v38 = vld [vmem:[#allocation10 + $0xe8] sm:$0xff] }
  0x2b   :  { %205 = vmatpush.msra.mxu1 %v164_v11  ;;  %v288_v36 = vld [vmem:[#allocation10 + $0xf8] sm:$0xff]  ;;  %295 = vmatpush.msra.mxu2 %v287_v35  ;;  %v285_v37 = vld [vmem:[#allocation10 + $0xe0] sm:$0xff]  ;;  %v283_v39 = vld [vmem:[#allocation10 + $0xd0] sm:$0xff] }
  0x2c   :  { %186 = vmatpush.msra.mxu0 %v147_v12  ;;  %v176_v33 = vld.sshfl [vmem:[#allocation1] sm:$0xff pattern:$0x73625140]  ;;  %v177_v34 = vld.sshfl [vmem:[#allocation1 + $0x8] sm:$0xff pattern:$0x73625140]  ;;  %315 = vmatpush.msra.mxu3 %v288_v36 }
  0x2d   :  { %206 = vmatpush.msra.mxu1 %v163_v13  ;;  %v284_v40 = vld [vmem:[#allocation10 + $0xd8] sm:$0xff]  ;;  %296 = vmatpush.msra.mxu2 %v285_v37  ;;  %v281_v41 = vld [vmem:[#allocation10 + $0xc0] sm:$0xff]  ;;  %v282_v42 = vld [vmem:[#allocation10 + $0xc8] sm:$0xff] }
  0x2e   :  { %187 = vmatpush.msra.mxu0 %v146_v15  ;;  %316 = vmatpush.msra.mxu3 %v286_v38  ;;  %v705_v43 = vld [vmem:[#allocation8] ss:$0 sm:$0xff]  ;;  %v279_v44 = vld [vmem:[#allocation10 + $0xb0] sm:$0xff]  ;;  %v277_v46 = vld [vmem:[#allocation10 + $0xa0] sm:$0xff] }
  0x2f   :  { %207 = vmatpush.msra.mxu1 %v162_v16  ;;  %297 = vmatpush.msra.mxu2 %v283_v39  ;;  %v280_v45 = vld [vmem:[#allocation10 + $0xb8] sm:$0xff]  ;;  %v278_v47 = vld [vmem:[#allocation10 + $0xa8] sm:$0xff]  ;;  %v275_v51 = vld [vmem:[#allocation10 + $0x90] sm:$0xff] }
  0x30   :  { %188 = vmatpush.msra.mxu0 %v145_v17  ;;  %317 = vmatpush.msra.mxu3 %v284_v40  ;;  %v276_v52 = vld [vmem:[#allocation10 + $0x98] sm:$0xff]  ;;  %v273_v54 = vld [vmem:[#allocation10 + $0x80] sm:$0xff]  ;;  %v274_v55 = vld [vmem:[#allocation10 + $0x88] sm:$0xff] }
  0x31   :  { %208 = vmatpush.msra.mxu1 %v161_v18  ;;  %298 = vmatpush.msra.mxu2 %v281_v41  ;;  %v271_v57 = vld [vmem:[#allocation10 + $0x70] sm:$0xff]  ;;  %v272_v58 = vld [vmem:[#allocation10 + $0x78] sm:$0xff]  ;;  %v269_v60 = vld [vmem:[#allocation10 + $0x60] sm:$0xff] }
  0x32   :  { %189 = vmatpush.msra.mxu0 %v144_v19  ;;  %318 = vmatpush.msra.mxu3 %v282_v42  ;;  %v270_v61 = vld [vmem:[#allocation10 + $0x68] sm:$0xff]  ;;  %v267_v63 = vld [vmem:[#allocation10 + $0x50] sm:$0xff]  ;;  %v268_v0 = vld [vmem:[#allocation10 + $0x58] sm:$0xff] }
  0x33   :  { %209 = vmatpush.msra.mxu1 %v160_v20  ;;  %299 = vmatpush.msra.mxu2 %v279_v44  ;;  %v265_v2 = vld [vmem:[#allocation10 + $0x40] sm:$0xff]  ;;  %v266_v3 = vld [vmem:[#allocation10 + $0x48] sm:$0xff]  ;;  %v263_v4 = vld [vmem:[#allocation10 + $0x30] sm:$0xff] }
  0x34   :  { %190 = vmatpush.msra.mxu0 %v143_v21  ;;  %319 = vmatpush.msra.mxu3 %v280_v45  ;;  %v264_v5 = vld [vmem:[#allocation10 + $0x38] sm:$0xff]  ;;  %v261_v6 = vld [vmem:[#allocation10 + $0x20] sm:$0xff]  ;;  %v262_v7 = vld [vmem:[#allocation10 + $0x28] sm:$0xff] }
  0x35   :  { %210 = vmatpush.msra.mxu1 %v159_v22  ;;  %300 = vmatpush.msra.mxu2 %v277_v46  ;;  %v259_v8 = vld [vmem:[#allocation10 + $0x10] sm:$0xff]  ;;  %v260_v9 = vld [vmem:[#allocation10 + $0x18] sm:$0xff]  ;;  %v257_v11 = vld [vmem:[#allocation10] sm:$0xff] }
  0x36   :  { %191 = vmatpush.msra.mxu0 %v142_v23  ;;  %320 = vmatpush.msra.mxu3 %v278_v47  ;;  %v258_v12 = vld [vmem:[#allocation10 + $0x8] sm:$0xff]  ;;  %v1015_v17 = vld [vmem:[#allocation13 + $0xf0] sm:$0xff]  ;;  %v1025_v23 = vld [vmem:[#allocation13 + $0xe0] sm:$0xff] }
  0x37   :  { %211 = vmatpush.msra.mxu1 %v158_v24  ;;  %301 = vmatpush.msra.mxu2 %v275_v51  ;;  %v1017_v18 = vld [vmem:[#allocation13 + $0x1f0] sm:$0xff]  ;;  %v1019_v19 = vld [vmem:[#allocation13 + $0xf8] sm:$0xff]  ;;  %v1027_v24 = vld [vmem:[#allocation13 + $0x1e0] sm:$0xff] }
  0x38   :  { %192 = vmatpush.msra.mxu0 %v141_v25  ;;  %321 = vmatpush.msra.mxu3 %v276_v52  ;;  %v1023_v22 = vld [vmem:[#allocation13 + $0x1f8] sm:$0xff]  ;;  %v1031_v25 = vld [vmem:[#allocation13 + $0xe8] sm:$0xff]  ;;  %v1064_v40 = vld [vmem:[#allocation13 + $0xb0] sm:$0xff] }
  0x39   :  { %212 = vmatpush.msra.mxu1 %v157_v26  ;;  %302 = vmatpush.msra.mxu2 %v273_v54  ;;  %v1033_v26 = vld [vmem:[#allocation13 + $0x1e8] sm:$0xff]  ;;  %v1066_v41 = vld [vmem:[#allocation13 + $0x1b0] sm:$0xff]  ;;  %v1073_v44 = vld [vmem:[#allocation13 + $0x1b8] sm:$0xff] }
  0x3a   :  { %193 = vmatpush.msra.mxu0 %v140_v27  ;;  %322 = vmatpush.msra.mxu3 %v274_v55  ;;  %v1035_v27 = vld [vmem:[#allocation13 + $0xd0] sm:$0xff]  ;;  %v1054_v36 = vld [vmem:[#allocation13 + $0xc8] sm:$0xff]  ;;  %v1077_v45 = vld [vmem:[#allocation13 + $0xa0] sm:$0xff] }
  0x3b   :  { %213 = vmatpush.msra.mxu1 %v156_v28  ;;  %303 = vmatpush.msra.mxu2 %v271_v57  ;;  %v1056_v37 = vld [vmem:[#allocation13 + $0x1c8] sm:$0xff]  ;;  %v1079_v46 = vld [vmem:[#allocation13 + $0x1a0] sm:$0xff]  ;;  %v1089_v51 = vld [vmem:[#allocation13 + $0x90] sm:$0xff] }
  0x3c   :  { %194 = vmatpush.msra.mxu0 %v139_v29  ;;  %323 = vmatpush.msra.mxu3 %v272_v58  ;;  %v1039_v29 = vld [vmem:[#allocation13 + $0x1d0] sm:$0xff]  ;;  %v1096_v55 = vld [vmem:[#allocation13 + $0x98] sm:$0xff]  ;;  %v1102_v57 = vld [vmem:[#allocation13 + $0x80] sm:$0xff] }
  0x3d   :  { %214 = vmatpush.msra.mxu1 %v155_v30  ;;  %304 = vmatpush.msra.mxu2 %v269_v60  ;;  %v1041_v30 = vld [vmem:[#allocation13 + $0xd8] sm:$0xff]  ;;  %v1091_v52 = vld [vmem:[#allocation13 + $0x190] sm:$0xff]  ;;  %v1104_v58 = vld [vmem:[#allocation13 + $0x180] sm:$0xff] }
  0x3e   :  { %195 = vmatpush.msra.mxu0 %v138_v31  ;;  %324 = vmatpush.msra.mxu3 %v270_v61  ;;  %v1043_v31 = vld [vmem:[#allocation13 + $0x1d8] sm:$0xff]  ;;  %v1108_v60 = vld [vmem:[#allocation13 + $0x88] sm:$0xff]  ;;  %v1197_v14 = vld [vmem:[#allocation13 + $0x110] sm:$0xff] }
  0x3f   :  { %215 = vmatpush.msra.mxu1 %v154_v32  ;;  %196 = vmatmul.f32.vlgmr.msra.gmra.mxu0 %v176_v33  ;;  %v1048_v33 = vld [vmem:[#allocation13 + $0xc0] sm:$0xff]  ;;  %v1110_v61 = vld [vmem:[#allocation13 + $0x188] sm:$0xff] }
  0x40   :  { %216 = vmatmul.f32.vlgmr.msra.gmra.mxu1 %v177_v34  ;;  %305 = vmatpush.msra.mxu2 %v267_v63  ;;  %v1050_v34 = vld [vmem:[#allocation13 + $0x1c0] sm:$0xff]  ;;  %v1114_v63 = vld [vmem:[#allocation13 + $0x70] sm:$0xff] }
  0x41   :  { %325 = vmatpush.msra.mxu3 %v268_v0  ;;  %399 = vmatpush.msrb.mxu0 %v1015_v17  ;;  %v1116_v0 = vld [vmem:[#allocation13 + $0x170] sm:$0xff] }
  0x42   :  { %306 = vmatpush.msra.mxu2 %v265_v2  ;;  %419 = vmatpush.msrb.mxu1 %v1017_v18  ;;  %v1121_v2 = vld [vmem:[#allocation13 + $0x78] sm:$0xff] }
  0x43   :  { %326 = vmatpush.msra.mxu3 %v266_v3  ;;  %400 = vmatpush.msrb.mxu0 %v1025_v23  ;;  %v1123_v3 = vld [vmem:[#allocation13 + $0x178] sm:$0xff] }
  0x44   :  { %307 = vmatpush.msra.mxu2 %v263_v4  ;;  %420 = vmatpush.msrb.mxu1 %v1027_v24  ;;  %v1127_v4 = vld [vmem:[#allocation13 + $0x60] sm:$0xff] }
  0x45   :  { %327 = vmatpush.msra.mxu3 %v264_v5  ;;  %401 = vmatpush.msrb.mxu0 %v1035_v27  ;;  %v1129_v5 = vld [vmem:[#allocation13 + $0x160] sm:$0xff] }
  0x46   :  { %308 = vmatpush.msra.mxu2 %v261_v6  ;;  %421 = vmatpush.msrb.mxu1 %v1039_v29 }
  0x47   :  { %328 = vmatpush.msra.mxu3 %v262_v7  ;;  %402 = vmatpush.msrb.mxu0 %v1048_v33  ;;  %v1133_v7 = vld [vmem:[#allocation13 + $0x68] sm:$0xff] }
  0x48   :  { %309 = vmatpush.msra.mxu2 %v259_v8  ;;  %422 = vmatpush.msrb.mxu1 %v1050_v34  ;;  %v1135_v8 = vld [vmem:[#allocation13 + $0x168] sm:$0xff] }
  0x49   :  { %329 = vmatpush.msra.mxu3 %v260_v9  ;;  %403 = vmatpush.msrb.mxu0 %v1064_v40  ;;  %v1139_v9 = vld [vmem:[#allocation13 + $0x50] sm:$0xff] }
  0x4a   :  { %310 = vmatpush.msra.mxu2 %v257_v11  ;;  %423 = vmatpush.msrb.mxu1 %v1066_v41 }
  0x4b   :  { %330 = vmatpush.msra.mxu3 %v258_v12  ;;  %404 = vmatpush.msrb.mxu0 %v1077_v45  ;;  %v1146_v12 = vld [vmem:[#allocation13 + $0x58] sm:$0xff] }
  0x4c   :  { %439 = vmatpush.msrb.mxu2 %v1019_v19  ;;  %424 = vmatpush.msrb.mxu1 %v1079_v46 }
  0x4d   :  { %459 = vmatpush.msrb.mxu3 %v1023_v22  ;;  %405 = vmatpush.msrb.mxu0 %v1089_v51 }
  0x4e   :  { %440 = vmatpush.msrb.mxu2 %v1031_v25  ;;  %425 = vmatpush.msrb.mxu1 %v1091_v52 }
  0x4f   :  { %460 = vmatpush.msrb.mxu3 %v1033_v26  ;;  %406 = vmatpush.msrb.mxu0 %v1102_v57 }
  0x50   :  { %441 = vmatpush.msrb.mxu2 %v1041_v30  ;;  %426 = vmatpush.msrb.mxu1 %v1104_v58 }
  0x51   :  { %461 = vmatpush.msrb.mxu3 %v1043_v31  ;;  %407 = vmatpush.msrb.mxu0 %v1114_v63 }
  0x52   :  { %442 = vmatpush.msrb.mxu2 %v1054_v36  ;;  %427 = vmatpush.msrb.mxu1 %v1116_v0 }
  0x53   :  { %462 = vmatpush.msrb.mxu3 %v1056_v37  ;;  %408 = vmatpush.msrb.mxu0 %v1127_v4 }
  0x54   :  { %428 = vmatpush.msrb.mxu1 %v1129_v5 }
  0x55   :  { %463 = vmatpush.msrb.mxu3 %v1073_v44  ;;  %409 = vmatpush.msrb.mxu0 %v1139_v9 }
  0xbc   :  { %v197_v48 = vpop.f32.mrf.mxu0 }
  0xbd   :  { %v217_v49 = vpop.f32.mrf.mxu1  ;;  %v198_v50 = vadd.f32 %v705_v43, %v197_v48  ;;  %v1071_v43 = vld [vmem:[#allocation13 + $0xb8] sm:$0xff]  ;;  %v1083_v48 = vld [vmem:[#allocation13 + $0xa8] sm:$0xff] }
  0xbe   :  { %443 = vmatpush.msrb.mxu2 %v1071_v43 }
  0xbf   :  { %v1009_v53 = vadd.f32 %v217_v49, %v198_v50  ;;  %v1085_v49 = vld [vmem:[#allocation13 + $0x1a8] sm:$0xff] }
  0xc0   :  { %444 = vmatpush.msrb.mxu2 %v1083_v48  ;;  %464 = vmatpush.msrb.mxu3 %v1085_v49 }
  0xc1   :  { %v220_v56 = vmul.f32 0.70710677, %v1009_v53  ;;  %vm252_vm4 = vcmp.ge.f32.partialorder %v1009_v53, 0.0 }
  0xc2   :  { %445 = vmatpush.msrb.mxu2 %v1096_v55 }
  0xc3   :  { %v1012_v59 = vand.u32 2147483647, %v220_v56  ;;  %v1098_v56 = vld [vmem:[#allocation13 + $0x198] sm:$0xff] }
  0xc4   :  { %465 = vmatpush.msrb.mxu3 %v1098_v56  ;;  %446 = vmatpush.msrb.mxu2 %v1108_v60 }
  0xc5   :  { %v222_v62 = vmul.f32 0.3275911, %v1012_v59  ;;  %v247_v38 = vmul.f32 %v1012_v59, %v1012_v59 }
  0xc6   :  { %466 = vmatpush.msrb.mxu3 %v1110_v61  ;;  %447 = vmatpush.msrb.mxu2 %v1121_v2 }
  0xc7   :  { %v223_v1 = vadd.f32 1.0, %v222_v62  ;;  %v248_v50 = vsub.f32 0.0, %v247_v38 }
  0xc8   :  { %467 = vmatpush.msrb.mxu3 %v1123_v3  ;;  %448 = vmatpush.msrb.mxu2 %v1133_v7 }
  0xc9   :  { %706 = vrcp.f32 %v223_v1  ;;  %v235_v16 = vand.u32 2147483648, %v223_v1  ;;  %v233_v21 = vand.u32 2147483647, %v223_v1  ;;  %vm229_vm1 = vweird.f32 %v223_v1 }
  0xca   :  { %v249_v62 = vmul.f32 1.442695, %v248_v50  ;;  %468 = vmatpush.msrb.mxu3 %v1135_v8  ;;  %449 = vmatpush.msrb.mxu2 %v1146_v12 }
  0xcb   :  { %v236_v32 = vor.u32 1.1754944e-38, %v235_v16  ;;  %vm234_vm3 = vcmp.eq.f32.partialorder %v233_v21, 8.507059e+37  ;;  %v1154_v16 = vld [vmem:[#allocation13 + $0x140] sm:$0xff]  ;;  %v1158_v21 = vld [vmem:[#allocation13 + $0x48] sm:$0xff] }
  0xcc   :  { %708 = vpow2.f32 %v249_v62  ;;  %450 = vmatpush.msrb.mxu2 %v1158_v21 }
  0xcf   :  { %v707_v10 = vpop.eup %706 }
  0xd0   :  { %v225_v13 = vmul.f32 %v707_v10, %v223_v1  ;;  %vm230_vm0 = vweird.f32 %v707_v10 }
  0xd1   :  { %vm231_vm2 = vmor %vm229_vm1, %vm230_vm0 }
  0xd2   :  { %v226_v15 = vsub.f32 1.0, %v225_v13  ;;  %v1148_v13 = vld [vmem:[#allocation13 + $0x158] sm:$0xff]  ;;  %v709_v50 = vpop.eup %708 }
  0xd3   :  { %469 = vmatpush.msrb.mxu3 %v1148_v13 }
  0xd4   :  { %v227_v20 = vmul.f32 %v707_v10, %v226_v15  ;;  %v1152_v15 = vld [vmem:[#allocation13 + $0x40] sm:$0xff] }
  0xd5   :  { %410 = vmatpush.msrb.mxu0 %v1152_v15 }
  0xd6   :  { %v228_v28 = vadd.f32 %v707_v10, %v227_v20 }
  0xd8   :  { %v232_v35 = vsel %vm231_vm2, %v707_v10, %v228_v28  ;;  %v1141_v10 = vld [vmem:[#allocation13 + $0x150] sm:$0xff]  ;;  %v1160_v28 = vld [vmem:[#allocation13 + $0x148] sm:$0xff] }
  0xd9   :  { %v1060_v39 = vsel %vm234_vm3, %v236_v32, %v232_v35  ;;  %429 = vmatpush.msrb.mxu1 %v1141_v10  ;;  %v1164_v32 = vld [vmem:[#allocation13 + $0x30] sm:$0xff]  ;;  %470 = vmatpush.msrb.mxu3 %v1160_v28 }
  0xda   :  { %v238_v42 = vmul.f32 1.0614054, %v1060_v39  ;;  %v1166_v35 = vld [vmem:[#allocation13 + $0x130] sm:$0xff]  ;;  %411 = vmatpush.msrb.mxu0 %v1164_v32 }
  0xdb   :  { %430 = vmatpush.msrb.mxu1 %v1154_v16 }
  0xdc   :  { %v239_v47 = vadd.f32 -1.4531521, %v238_v42  ;;  %v1171_v42 = vld [vmem:[#allocation13 + $0x38] sm:$0xff] }
  0xdd   :  { %431 = vmatpush.msrb.mxu1 %v1166_v35  ;;  %451 = vmatpush.msrb.mxu2 %v1171_v42 }
  0xde   :  { %v240_v54 = vmul.f32 %v239_v47, %v1060_v39  ;;  %v1173_v47 = vld [vmem:[#allocation13 + $0x138] sm:$0xff] }
  0xdf   :  { %1315 = vst [vmem:[#allocation21_spill] sm:$0xff] %v1173_v47  ;;  %471 = vmatpush.msrb.mxu3 %v1173_v47  ;;  %v1199_v47 = vld [vmem:[#allocation13 + $0x18] sm:$0xff] }
  0xe0   :  { %v241_v59 = vadd.f32 1.4214138, %v240_v54  ;;  %v1177_v54 = vld [vmem:[#allocation13 + $0x20] sm:$0xff] }
  0xe1   :  { %412 = vmatpush.msrb.mxu0 %v1177_v54 }
  0xe2   :  { %v242_v1 = vmul.f32 %v241_v59, %v1060_v39  ;;  %v1179_v59 = vld [vmem:[#allocation13 + $0x120] sm:$0xff] }
  0xe3   :  { %1316 = vst [vmem:[#allocation22_spill] sm:$0xff] %v1179_v59  ;;  %432 = vmatpush.msrb.mxu1 %v1179_v59  ;;  %v1203_v59 = vld [vmem:[#allocation13 + $0x118] sm:$0xff] }
  0xe4   :  { %v243_v6 = vadd.f32 -0.28449672, %v242_v1  ;;  %v1185_v1 = vld [vmem:[#allocation13 + $0x128] sm:$0xff] }
  0xe5   :  { %472 = vmatpush.msrb.mxu3 %v1185_v1  ;;  %433 = vmatpush.msrb.mxu1 %v1197_v14 }
  0xe6   :  { %v244_v11 = vmul.f32 %v243_v6, %v1060_v39 }
  0xe7   :  { %473 = vmatpush.msrb.mxu3 %v1203_v59 }
  0xe8   :  { %v245_v20 = vadd.f32 0.2548296, %v244_v11  ;;  %v255_v11 = vmul.f32 0.5, %v1009_v53  ;;  %v1205_v53 = vld [vmem:[#allocation13] sm:$0xff] }
  0xea   :  { %v246_v38 = vmul.f32 %v245_v20, %v1060_v39  ;;  %v1183_v39 = vld [vmem:[#allocation13 + $0x28] sm:$0xff] }
  0xeb   :  { %1317 = vst [vmem:[#allocation23_spill] sm:$0xff] %v1183_v39  ;;  %452 = vmatpush.msrb.mxu2 %v1183_v39  ;;  %v1207_v39 = vld [vmem:[#allocation13 + $0x100] sm:$0xff] }
  0xec   :  { %v251_v62 = vmul.f32 %v709_v50, %v246_v38  ;;  %v1195_v50 = vld [vmem:[#allocation13 + $0x10] sm:$0xff]  ;;  %434 = vmatpush.msrb.mxu1 %v1207_v39 }
  0xed   :  { %413 = vmatpush.msrb.mxu0 %v1195_v50  ;;  %453 = vmatpush.msrb.mxu2 %v1199_v47 }
  0xee   :  { %v253_v6 = vsub.f32 2.0, %v251_v62  ;;  %503 = vmatpush.msra.mxu1 %v1017_v18 }
  0xef   :  { %414 = vmatpush.msrb.mxu0 %v1205_v53 }
  0xf0   :  { %v254_v20 = vsel %vm252_vm4, %v253_v6, %v251_v62  ;;  %v1211_v62 = vld [vmem:[#allocation13 + $0x8] sm:$0xff]  ;;  %504 = vmatpush.msra.mxu1 %v1027_v24 }
  0xf1   :  { %v256_v38 = vmul.f32 %v255_v11, %v254_v20  ;;  %v1213_v6 = vld [vmem:[#allocation13 + $0x108] sm:$0xff]  ;;  %454 = vmatpush.msrb.mxu2 %v1211_v62  ;;  %483 = vmatpush.msra.mxu0 %v1015_v17  ;;  %v289_v17 = vld [vmem:[%s1303_s5] sm:$0x3] }
  0xf2   :  { %474 = vmatpush.msrb.mxu3 %v1213_v6  ;;  %505 = vmatpush.msra.mxu1 %v1039_v29  ;;  %v291_v18 = vperm.slane %v289_v17, 0 }
  0xf3   :  { %311 = vmatmul.f32.vlgmr.msra.gmra.mxu2 %v256_v38  ;;  %331 = vmatmul.f32.vlgmr.msra.gmra.mxu3 %v256_v38 }
  0xf4   :  { %523 = vmatpush.msra.mxu2 %v1019_v19  ;;  %543 = vmatpush.msra.mxu3 %v1023_v22  ;;  %v292_v19 = vperm.slane %v289_v17, 1  ;;  %v1318_v22 = vld [vmem:[#allocation21_spill] sm:$0xff] }
  0xf5   :  { %484 = vmatpush.msra.mxu0 %v1025_v23  ;;  %506 = vmatpush.msra.mxu1 %v1050_v34  ;;  %v1319_v23 = vld [vmem:[#allocation23_spill] sm:$0xff] }
  0xf6   :  { %524 = vmatpush.msra.mxu2 %v1031_v25  ;;  %544 = vmatpush.msra.mxu3 %v1033_v26  ;;  %v1320_v26 = vld [vmem:[#allocation22_spill] sm:$0xff] }
  0xf7   :  { %485 = vmatpush.msra.mxu0 %v1035_v27  ;;  %507 = vmatpush.msra.mxu1 %v1066_v41 }
  0xf8   :  { %525 = vmatpush.msra.mxu2 %v1041_v30  ;;  %545 = vmatpush.msra.mxu3 %v1043_v31  ;;  %v603_v30 = vld [vmem:[#allocation11 + $0x8] sm:$0xff]  ;;  %v602_v31 = vld [vmem:[#allocation11] sm:$0xff] }
  0xf9   :  { %486 = vmatpush.msra.mxu0 %v1048_v33  ;;  %508 = vmatpush.msra.mxu1 %v1079_v46  ;;  %v601_v46 = vld [vmem:[#allocation5] sm:$0x3] }
  0xfa   :  { %526 = vmatpush.msra.mxu2 %v1054_v36  ;;  %546 = vmatpush.msra.mxu3 %v1056_v37 }
  0xfb   :  { %487 = vmatpush.msra.mxu0 %v1064_v40  ;;  %509 = vmatpush.msra.mxu1 %v1091_v52 }
  0xfc   :  { %527 = vmatpush.msra.mxu2 %v1071_v43  ;;  %547 = vmatpush.msra.mxu3 %v1073_v44 }
  0xfd   :  { %488 = vmatpush.msra.mxu0 %v1077_v45  ;;  %510 = vmatpush.msra.mxu1 %v1104_v58 }
  0xfe   :  { %528 = vmatpush.msra.mxu2 %v1083_v48  ;;  %548 = vmatpush.msra.mxu3 %v1085_v49  ;;  %v1321_v48 = vld [vmem:[#allocation20_spill] sm:$0xff] }
  0xff   :  { %489 = vmatpush.msra.mxu0 %v1089_v51  ;;  %511 = vmatpush.msra.mxu1 %v1116_v0  ;;  %v650_v49 = vmul.f32 1.442695, %v1321_v48  ;;  %v649_v51 = vadd.f32 1.0, %v1321_v48  ;;  %vm648_vm6 = vcmp.gt.f32.partialorder %v1321_v48, 0.0 }
 0x100   :  { %529 = vmatpush.msra.mxu2 %v1096_v55  ;;  %549 = vmatpush.msra.mxu3 %v1098_v56 }
 0x101   :  { %490 = vmatpush.msra.mxu0 %v1102_v57  ;;  %512 = vmatpush.msra.mxu1 %v1129_v5  ;;  %710 = vpow2.f32 %v650_v49 }
 0x102   :  { %530 = vmatpush.msra.mxu2 %v1108_v60  ;;  %550 = vmatpush.msra.mxu3 %v1110_v61 }
 0x103   :  { %491 = vmatpush.msra.mxu0 %v1114_v63  ;;  %513 = vmatpush.msra.mxu1 %v1141_v10 }
 0x104   :  { %531 = vmatpush.msra.mxu2 %v1121_v2  ;;  %551 = vmatpush.msra.mxu3 %v1123_v3 }
 0x105   :  { %492 = vmatpush.msra.mxu0 %v1127_v4  ;;  %514 = vmatpush.msra.mxu1 %v1154_v16 }
 0x106   :  { %532 = vmatpush.msra.mxu2 %v1133_v7  ;;  %552 = vmatpush.msra.mxu3 %v1135_v8 }
 0x107   :  { %493 = vmatpush.msra.mxu0 %v1139_v9  ;;  %515 = vmatpush.msra.mxu1 %v1166_v35  ;;  %v711_v52 = vpop.eup %710 }
 0x108   :  { %533 = vmatpush.msra.mxu2 %v1146_v12  ;;  %553 = vmatpush.msra.mxu3 %v1148_v13  ;;  %v652_v55 = vsel %vm648_vm6, %v649_v51, %v711_v52 }
 0x109   :  { %494 = vmatpush.msra.mxu0 %v1152_v15  ;;  %516 = vmatpush.msra.mxu1 %v1320_v26  ;;  %654 = vst [vmem:[#allocation1] ss:$4 sm:$0xff] %v652_v55  ;;  %v585_v15 = vld [vmem:[%s1304_s6] sm:$0x3]  ;;  %s929_s6 = smov [#allocation14]  }
 0x10a   :  { %534 = vmatpush.msra.mxu2 %v1158_v21  ;;  %554 = vmatpush.msra.mxu3 %v1160_v28 }
 0x10b   :  { %495 = vmatpush.msra.mxu0 %v1164_v32  ;;  %517 = vmatpush.msra.mxu1 %v1197_v14  ;;  %v587_v32 = vperm.slane %v585_v15, 0 }
 0x10c   :  { %535 = vmatpush.msra.mxu2 %v1171_v42  ;;  %555 = vmatpush.msra.mxu3 %v1318_v22  ;;  %v593_v42 = vld [vmem:[%s1305_s7] sm:$0x3]  ;;  %s676_s7 = sshll.u32 %s929_s6, 4  ;;  %s677_s7 = int_to_ptr.vmem [resolvable:$true] %s676_s7 }
 0x10d   :  { %496 = vmatpush.msra.mxu0 %v1177_v54  ;;  %518 = vmatpush.msra.mxu1 %v1207_v39  ;;  %v588_v39 = vperm.slane %v585_v15, 1  ;;  %v596_v20 = vperm.slane %v593_v42, 1 }
 0x10e   :  { %536 = vmatpush.msra.mxu2 %v1319_v23  ;;  %556 = vmatpush.msra.mxu3 %v1185_v1 }
 0x10f   :  { %497 = vmatpush.msra.mxu0 %v1195_v50 }
 0x110   :  { %537 = vmatpush.msra.mxu2 %v1199_v47  ;;  %557 = vmatpush.msra.mxu3 %v1203_v59  ;;  %v595_v59 = vperm.slane %v593_v42, 0 }
 0x111   :  { %498 = vmatpush.msra.mxu0 %v1205_v53  ;;  %v655_v53 = vld.sshfl [vmem:[#allocation1] sm:$0xff pattern:$0x73625140] }
 0x112   :  { %538 = vmatpush.msra.mxu2 %v1211_v62  ;;  %558 = vmatpush.msra.mxu3 %v1213_v6  ;;  %v656_v62 = vld.sshfl [vmem:[#allocation1 + $0x8] sm:$0xff pattern:$0x73625140] }
 0x176   :  { %v312_v24 = vpop.f32.mrf.mxu2  ;;  %v332_v25 = vpop.f32.mrf.mxu3 }
 0x177   :  { %v313_v27 = vadd.f32 %v312_v24, %v291_v18  ;;  %v333_v29 = vadd.f32 %v332_v25, %v292_v19 }
 0x179   :  { %415 = vmatmul.f32.vlgmr.msrb.gmra.mxu0 %v313_v27  ;;  %435 = vmatmul.f32.vlgmr.msrb.gmra.mxu1 %v333_v29 }
 0x17a   :  { %455 = vmatmul.f32.vlgmr.msrb.gmra.mxu2 %v313_v27  ;;  %475 = vmatmul.f32.vlgmr.msrb.gmra.mxu3 %v333_v29 }
 0x17b   :  { %643 = vmatpush.msrb.mxu1 %v603_v30  ;;  %623 = vmatpush.msrb.mxu0 %v602_v31 }
 0x1f6   :  { %v416_v33 = vpop.f32.mrf.mxu0  ;;  %v436_v14 = vpop.f32.mrf.mxu1 }
 0x1f7   :  { %v437_v34 = vadd.f32 %v436_v14, %v416_v33 }
 0x1f9   :  { %v479_v36 = vsub.f32 %v313_v27, %v437_v34 }
 0x1fb   :  { %v481_v37 = vmul.f32 %v479_v36, %v479_v36 }
 0x1fd   :  { %v456_v40 = vpop.f32.mrf.mxu2  ;;  %v476_v41 = vpop.f32.mrf.mxu3  ;;  %499 = vmatmul.f32.vlgmr.msra.gmra.mxu0 %v481_v37  ;;  %539 = vmatmul.f32.vlgmr.msra.gmra.mxu2 %v481_v37 }
 0x1fe   :  { %v477_v43 = vadd.f32 %v476_v41, %v456_v40 }
 0x200   :  { %v480_v44 = vsub.f32 %v333_v29, %v477_v43 }
 0x202   :  { %v482_v45 = vmul.f32 %v480_v44, %v480_v44 }
 0x204   :  { %519 = vmatmul.f32.vlgmr.msra.gmra.mxu1 %v482_v45  ;;  %559 = vmatmul.f32.vlgmr.msra.gmra.mxu3 %v482_v45 }
 0x205   :  { %691 = vmatmul.msk.f32.vlgmr.msrb.gmra.mxu0 %vm604_vm5, %v601_v46 }
 0x20c   :  { %692 = vmatmul.msk.f32.vlgmr.msrb.gmra.mxu1 %vm604_vm5, %v601_v46 }
 0x27a   :  { %v500_v56 = vpop.f32.mrf.mxu0 }
 0x27b   :  { %v501_v57 = vadd.f32 1e-05, %v500_v56 }
 0x280   :  { %v540_v61 = vpop.f32.mrf.mxu2 }
 0x281   :  { %v520_v58 = vpop.f32.mrf.mxu1  ;;  %v541_v63 = vadd.f32 1e-05, %v540_v61 }
 0x282   :  { %v521_v60 = vadd.f32 %v520_v58, %v501_v57  ;;  %v625_v22 = vpop.f32.mrf.mxu0 }
 0x284   :  { %712 = vrsqrt.f32 %v521_v60  ;;  %vm569_vm8 = vweird.f32 %v521_v60 }
 0x287   :  { %v560_v0 = vpop.f32.mrf.mxu3 }
 0x288   :  { %v561_v2 = vadd.f32 %v560_v0, %v541_v63 }
 0x289   :  { %v645_v17 = vpop.f32.mrf.mxu1 }
 0x28a   :  { %v713_v3 = vpop.eup %712  ;;  %714 = vrsqrt.f32 %v561_v2  ;;  %vm579_vm11 = vweird.f32 %v561_v2 }
 0x28b   :  { %v564_v4 = vmul.f32 %v713_v3, %v521_v60  ;;  %vm570_vm7 = vweird.f32 %v713_v3 }
 0x28c   :  { %vm571_vm9 = vmor %vm569_vm8, %vm570_vm7 }
 0x28d   :  { %v565_v5 = vmul.f32 %v713_v3, %v564_v4 }
 0x28f   :  { %v566_v7 = vmul.f32 0.5, %v565_v5 }
 0x290   :  { %v715_v8 = vpop.eup %714 }
 0x291   :  { %v567_v9 = vsub.f32 1.5, %v566_v7  ;;  %v574_v10 = vmul.f32 %v715_v8, %v561_v2  ;;  %vm580_vm10 = vweird.f32 %v715_v8 }
 0x292   :  { %vm581_vm12 = vmor %vm579_vm11, %vm580_vm10 }
 0x293   :  { %v568_v12 = vmul.f32 %v713_v3, %v567_v9  ;;  %v575_v13 = vmul.f32 %v715_v8, %v574_v10 }
 0x295   :  { %v572_v16 = vsel %vm571_vm9, %v713_v3, %v568_v12  ;;  %v576_v21 = vmul.f32 0.5, %v575_v13 }
 0x296   :  { %v583_v28 = vmul.f32 %v572_v16, %v479_v36 }
 0x297   :  { %v577_v35 = vsub.f32 1.5, %v576_v21 }
 0x298   :  { %v591_v54 = vmul.f32 %v587_v32, %v583_v28 }
 0x299   :  { %v578_v47 = vmul.f32 %v715_v8, %v577_v35 }
 0x29a   :  { %v599_v38 = vadd.f32 %v595_v59, %v591_v54 }
 0x29b   :  { %v582_v1 = vsel %vm581_vm12, %v715_v8, %v578_v47 }
 0x29c   :  { %v584_v11 = vmul.f32 %v582_v1, %v480_v44  ;;  %v659_v18 = vsub.f32 %v599_v38, %v655_v53 }
 0x29e   :  { %v592_v50 = vmul.f32 %v588_v39, %v584_v11  ;;  %v661_v24 = vmul.f32 %v659_v18, %v625_v22 }
 0x2a0   :  { %v600_v6 = vadd.f32 %v596_v20, %v592_v50 }
 0x2a2   :  { %v660_v19 = vsub.f32 %v600_v6, %v656_v62 }
 0x2a4   :  { %v662_v23 = vmul.f32 %v660_v19, %v645_v17 }
 0x2a6   :  { %v665_v25 = vrot.slane %v662_v23, 6 }
 0x2a8   :  { %v667_v26 = vsel %vm666_vm13, %v661_v24, %v665_v25 }
 0x2a9   :  { %v669_v27 = vadd.f32 %v667_v26, %v652_v55 }
 0x2ab   :  { %670 = vst [vmem:[#allocation14] sm:$0xf] %v669_v27 }
 0x2ac   :  { %681 = dma.vmem_to_hbm [thread:$0]  %s677_s7, 64, %s679_s30, [#allocation4]  }
 0x2ad   :  { %916 = dma.done.wait [#allocation4], 64  }
 0x2ae   :  { %917 = vsyncadd [#allocation4], 4294967232 }
 0x2af   :  { %686 = vsyncpa [#allocation3], 1 }
 0x2b0   :  { %687 = vsyncpa [#allocation6], 1 }
 0x2b1   :  { %688 = vsyncpa [#allocation9], 1 }
 0x2b2   :  { %689 = vsyncpa [#allocation12], 1 }
 0x2b3   :  { %690 = vsyncpa [#allocation4], 1 }

</bundles_post_ra>
